<compile_context>
chip_gen: v7x
topology: tpu7x:2x2x1
jax: 0.10.0
libtpu: 0.0.40
codegen_flags: <defaults>
</compile_context>

<pallas_src>
import jax
import jax.numpy as jnp
import numpy as np
from jax.experimental import pallas as pl
from jax.experimental.pallas import tpu as pltpu

INPUT_LEN = 512
HIDDEN = 256
OUTPUT = 128
NEG_SLOPE = 0.1


def _round_up(n, m):
    return ((n + m - 1) // m) * m


def _cdiv(a, b):
    return -(-a // b)


def _leaky_relu(v):
    # max(v, a*v) == LeakyReLU(a) for 0 < a < 1; cheaper than cmp+mul+select.
    return jnp.maximum(v, NEG_SLOPE * v)


def mlp_kernel(x_ref,
               w1_ref, b1_ref,
               w2_ref, b2_ref,
               w3_ref, b3_ref,
               w4_ref, b4_ref,
               w5_ref, b5_ref,
               o_ref):
    # Compute dtype = weight dtype (bf16 fast path); accumulation always f32.
    cdt = w1_ref.dtype

    def layer(h, w_ref, b_ref, *, act):
        y = jnp.dot(h.astype(cdt), w_ref[...],
                    preferred_element_type=jnp.float32) + b_ref[...]
        return _leaky_relu(y) if act else y

    # x is DMA'd in its native f32 and cast here (saves a wrapper-side pass).
    h = layer(x_ref[...], w1_ref, b1_ref, act=True)
    h = layer(h, w2_ref, b2_ref, act=True)
    h = layer(h, w3_ref, b3_ref, act=True)
    h = layer(h, w4_ref, b4_ref, act=True)
    o_ref[...] = layer(h, w5_ref, b5_ref, act=False).astype(o_ref.dtype)


def prepare_params(params, compute_dtype=jnp.bfloat16):
    """Cast weights once (outside the per-call path). Returns a flat tuple
    (w1, b1, ..., w5, b5) with weights in compute_dtype and biases in f32."""
    flat = []
    for (w, b) in params:
        flat.append(jnp.asarray(w, compute_dtype))
        flat.append(jnp.asarray(b, jnp.float32).reshape(1, -1))
    return tuple(flat)


def _choose_tiling(B, batch_tile, row_align):
    """Pick (tile, B_pad): fewest grid steps whose tile fits batch_tile, with
    >=2 steps when B >= 512 (keeps both v7x TensorCores busy); padding is at
    most one row-alignment quantum per step."""
    n_steps = max(1, _cdiv(B, batch_tile))
    if n_steps == 1 and B >= 512:
        n_steps = 2
    tile = _round_up(max(_cdiv(B, n_steps), 1), row_align)
    return tile, tile * n_steps


def past_fc_encoder(x, flat_params, *, batch_tile=2048, out_dtype=jnp.float32):
    """x: (B, C, input_len // C) -> (B, output_dim). Matches PastFCEncoder.forward.

    flat_params: output of prepare_params() (weights pre-cast, fetched once per
    call thanks to constant index_maps)."""
    B = x.shape[0]
    x2d = x.reshape(B, -1)                      # flatten, same as torch reshape
    in_dim = x2d.shape[1]
    out_dim = flat_params[-2].shape[1]
    compute_dtype = flat_params[0].dtype

    # bf16 packs 16 rows per sublane group; f32 needs only 8.
    row_align = 16 if compute_dtype == jnp.bfloat16 else 8
    tile, B_pad = _choose_tiling(B, batch_tile, row_align)
    if B_pad != B:
        # Pad only the (small) remainder up to the alignment/step quantum.
        x2d = jnp.pad(x2d, ((0, B_pad - B), (0, 0)))

    def full(a):
        # Whole array resident in VMEM; constant index_map => fetched once.
        shape = a.shape
        return pl.BlockSpec(shape, lambda i: (0,) * len(shape))

    grid = (B_pad // tile,)
    out = pl.pallas_call(
        mlp_kernel,
        out_shape=jax.ShapeDtypeStruct((B_pad, out_dim), out_dtype),
        grid_spec=pltpu.PrefetchScalarGridSpec(
            num_scalar_prefetch=0,
            grid=grid,
            in_specs=[pl.BlockSpec((tile, in_dim), lambda i: (i, 0))]
                     + [full(a) for a in flat_params],
            out_specs=pl.BlockSpec((tile, out_dim), lambda i: (i, 0)),
        ),
        compiler_params=pltpu.CompilerParams(
            dimension_semantics=("parallel",),
            # Large tiles: double-buffered x (f32) + out + weights exceed the
            # 16 MiB v5e scoped default; 64 MiB fits all generations' physical
            # VMEM (v7x has 64 MiB physical).
            vmem_limit_bytes=64 << 20),
    )(x2d, *flat_params)
    return out[:B]


def init_params(key):
    """Deterministic init matching torch.nn.Linear default (U[-1/sqrt(fan_in), ...])."""
    dims = [(INPUT_LEN, HIDDEN), (HIDDEN, HIDDEN), (HIDDEN, HIDDEN),
            (HIDDEN, HIDDEN), (HIDDEN, OUTPUT)]
    params = []
    for (fan_in, fan_out) in dims:
        key, kw, kb = jax.random.split(key, 3)
        bound = 1.0 / np.sqrt(fan_in)
        w = jax.random.uniform(kw, (fan_in, fan_out), jnp.float32, -bound, bound)
        b = jax.random.uniform(kb, (1, fan_out), jnp.float32, -bound, bound)
        params.append((w, b))
    return params


def reference(x, params):
    h = x.reshape(x.shape[0], -1)
    for i, (w, b) in enumerate(params):
        h = h @ w + b
        if i < len(params) - 1:
            h = jnp.where(h > 0, h, NEG_SLOPE * h)
    return h


if __name__ == "__main__":
    key = jax.random.PRNGKey(0)
    kx, kp, kx2, kx3 = jax.random.split(key, 4)
    params = init_params(kp)

    # Cast weights once (hoisted out of the per-call path).
    flat_bf16 = prepare_params(params, jnp.bfloat16)
    flat_f32 = prepare_params(params, jnp.float32)

    # Small example: (batch, out_channels, input_len // out_channels).
    B, C = 8, 1
    x = jax.random.normal(kx, (B, C, INPUT_LEN // C), jnp.float32)
    ref = reference(x, params)

    # f32 validation path (tight tolerance).
    out_f32 = jax.block_until_ready(past_fc_encoder(x, flat_f32))
    np.testing.assert_allclose(np.asarray(out_f32), np.asarray(ref),
                               rtol=1e-5, atol=1e-5)
    assert out_f32.shape == (B, OUTPUT)

    # Default bf16 fast path (f32 accumulation) -> looser tolerance.
    out_bf16 = jax.block_until_ready(past_fc_encoder(x, flat_bf16))
    np.testing.assert_allclose(np.asarray(out_bf16), np.asarray(ref),
                               rtol=5e-2, atol=5e-2)
    assert out_bf16.shape == (B, OUTPUT)

    # Ragged batch below the 2-step threshold: single 304-row tile (pad of 4).
    B2, C2 = 300, 4
    x2 = jax.random.normal(kx2, (B2, C2, INPUT_LEN // C2), jnp.float32)
    out2 = jax.block_until_ready(past_fc_encoder(x2, flat_bf16))
    ref2 = reference(x2, params)
    np.testing.assert_allclose(np.asarray(out2), np.asarray(ref2),
                               rtol=5e-2, atol=5e-2)
    assert out2.shape == (B2, OUTPUT)

    # B >= 512: exercises the 2-grid-step split (both v7x TCs) + minimal pad.
    B3, C3 = 600, 2
    x3 = jax.random.normal(kx3, (B3, C3, INPUT_LEN // C3), jnp.float32)
    out3 = jax.block_until_ready(past_fc_encoder(x3, flat_bf16))
    ref3 = reference(x3, params)
    np.testing.assert_allclose(np.asarray(out3), np.asarray(ref3),
                               rtol=5e-2, atol=5e-2)
    assert out3.shape == (B3, OUTPUT)

    print("KERNEL_OK")
</pallas_src>

<mosaic_0001>
module attributes {stable_mosaic.version = 11 : i64} {
  func.func @mlp_kernel(%arg0: i32, %arg1: memref<8x512xf32, #tpu.memory_space<vmem>>, %arg2: memref<512x256xf32, #tpu.memory_space<vmem>>, %arg3: memref<1x256xf32, #tpu.memory_space<vmem>>, %arg4: memref<256x256xf32, #tpu.memory_space<vmem>>, %arg5: memref<1x256xf32, #tpu.memory_space<vmem>>, %arg6: memref<256x256xf32, #tpu.memory_space<vmem>>, %arg7: memref<1x256xf32, #tpu.memory_space<vmem>>, %arg8: memref<256x256xf32, #tpu.memory_space<vmem>>, %arg9: memref<1x256xf32, #tpu.memory_space<vmem>>, %arg10: memref<256x128xf32, #tpu.memory_space<vmem>>, %arg11: memref<1x128xf32, #tpu.memory_space<vmem>>, %arg12: memref<8x128xf32, #tpu.memory_space<vmem>>) attributes {dimension_semantics = [#tpu.dimension_semantics<parallel>], iteration_bounds = array<i64: 1>, scalar_prefetch = 0 : i64, scratch_operands = 0 : i64, tpu.core_type = #tpu.core_type<tc>, window_params = [{transform_indices = @transform_0, window_bounds = array<i64: 8, 512>}, {pipeline_mode = #tpu.pipeline_mode<synchronous>, transform_indices = @transform_1, window_bounds = array<i64: 512, 256>}, {pipeline_mode = #tpu.pipeline_mode<synchronous>, transform_indices = @transform_2, window_bounds = array<i64: 1, 256>}, {pipeline_mode = #tpu.pipeline_mode<synchronous>, transform_indices = @transform_3, window_bounds = array<i64: 256, 256>}, {pipeline_mode = #tpu.pipeline_mode<synchronous>, transform_indices = @transform_4, window_bounds = array<i64: 1, 256>}, {pipeline_mode = #tpu.pipeline_mode<synchronous>, transform_indices = @transform_5, window_bounds = array<i64: 256, 256>}, {pipeline_mode = #tpu.pipeline_mode<synchronous>, transform_indices = @transform_6, window_bounds = array<i64: 1, 256>}, {pipeline_mode = #tpu.pipeline_mode<synchronous>, transform_indices = @transform_7, window_bounds = array<i64: 256, 256>}, {pipeline_mode = #tpu.pipeline_mode<synchronous>, transform_indices = @transform_8, window_bounds = array<i64: 1, 256>}, {pipeline_mode = #tpu.pipeline_mode<synchronous>, transform_indices = @transform_9, window_bounds = array<i64: 256, 128>}, {pipeline_mode = #tpu.pipeline_mode<synchronous>, transform_indices = @transform_10, window_bounds = array<i64: 1, 128>}, {transform_indices = @transform_11, window_bounds = array<i64: 8, 128>}]} {
    %c0 = arith.constant 0 : index
    %c0_0 = arith.constant 0 : index
    %0 = vector.load %arg1[%c0, %c0_0] : memref<8x512xf32, #tpu.memory_space<vmem>>, vector<8x512xf32>
    %c0_1 = arith.constant 0 : index
    %c0_2 = arith.constant 0 : index
    %1 = vector.load %arg2[%c0_1, %c0_2] : memref<512x256xf32, #tpu.memory_space<vmem>>, vector<512x256xf32>
    %cst = arith.constant dense<0.000000e+00> : vector<8x256xf32>
    %2 = tpu.matmul %0, %1, %cst {dimension_numbers = #tpu.dot_dimension_numbers<[1], [0], [0], [1], [0, 0, 1, 1], [], []>} : vector<8x512xf32>, vector<512x256xf32>, vector<8x256xf32> -> vector<8x256xf32>
    %c0_3 = arith.constant 0 : index
    %c0_4 = arith.constant 0 : index
    %3 = vector.load %arg3[%c0_3, %c0_4] : memref<1x256xf32, #tpu.memory_space<vmem>>, vector<1x256xf32>
    %4 = vector.broadcast %3 : vector<1x256xf32> to vector<8x256xf32>
    %5 = arith.addf %2, %4 : vector<8x256xf32>
    %cst_5 = arith.constant 1.000000e-01 : f32
    %6 = vector.broadcast %cst_5 : f32 to vector<8x256xf32>
    %7 = arith.mulf %6, %5 : vector<8x256xf32>
    %8 = arith.maximumf %5, %7 : vector<8x256xf32>
    %c0_6 = arith.constant 0 : index
    %c0_7 = arith.constant 0 : index
    %9 = vector.load %arg4[%c0_6, %c0_7] : memref<256x256xf32, #tpu.memory_space<vmem>>, vector<256x256xf32>
    %cst_8 = arith.constant dense<0.000000e+00> : vector<8x256xf32>
    %10 = tpu.matmul %8, %9, %cst_8 {dimension_numbers = #tpu.dot_dimension_numbers<[1], [0], [0], [1], [0, 0, 1, 1], [], []>} : vector<8x256xf32>, vector<256x256xf32>, vector<8x256xf32> -> vector<8x256xf32>
    %c0_9 = arith.constant 0 : index
    %c0_10 = arith.constant 0 : index
    %11 = vector.load %arg5[%c0_9, %c0_10] : memref<1x256xf32, #tpu.memory_space<vmem>>, vector<1x256xf32>
    %12 = vector.broadcast %11 : vector<1x256xf32> to vector<8x256xf32>
    %13 = arith.addf %10, %12 : vector<8x256xf32>
    %cst_11 = arith.constant 1.000000e-01 : f32
    %14 = vector.broadcast %cst_11 : f32 to vector<8x256xf32>
    %15 = arith.mulf %14, %13 : vector<8x256xf32>
    %16 = arith.maximumf %13, %15 : vector<8x256xf32>
    %c0_12 = arith.constant 0 : index
    %c0_13 = arith.constant 0 : index
    %17 = vector.load %arg6[%c0_12, %c0_13] : memref<256x256xf32, #tpu.memory_space<vmem>>, vector<256x256xf32>
    %cst_14 = arith.constant dense<0.000000e+00> : vector<8x256xf32>
    %18 = tpu.matmul %16, %17, %cst_14 {dimension_numbers = #tpu.dot_dimension_numbers<[1], [0], [0], [1], [0, 0, 1, 1], [], []>} : vector<8x256xf32>, vector<256x256xf32>, vector<8x256xf32> -> vector<8x256xf32>
    %c0_15 = arith.constant 0 : index
    %c0_16 = arith.constant 0 : index
    %19 = vector.load %arg7[%c0_15, %c0_16] : memref<1x256xf32, #tpu.memory_space<vmem>>, vector<1x256xf32>
    %20 = vector.broadcast %19 : vector<1x256xf32> to vector<8x256xf32>
    %21 = arith.addf %18, %20 : vector<8x256xf32>
    %cst_17 = arith.constant 1.000000e-01 : f32
    %22 = vector.broadcast %cst_17 : f32 to vector<8x256xf32>
    %23 = arith.mulf %22, %21 : vector<8x256xf32>
    %24 = arith.maximumf %21, %23 : vector<8x256xf32>
    %c0_18 = arith.constant 0 : index
    %c0_19 = arith.constant 0 : index
    %25 = vector.load %arg8[%c0_18, %c0_19] : memref<256x256xf32, #tpu.memory_space<vmem>>, vector<256x256xf32>
    %cst_20 = arith.constant dense<0.000000e+00> : vector<8x256xf32>
    %26 = tpu.matmul %24, %25, %cst_20 {dimension_numbers = #tpu.dot_dimension_numbers<[1], [0], [0], [1], [0, 0, 1, 1], [], []>} : vector<8x256xf32>, vector<256x256xf32>, vector<8x256xf32> -> vector<8x256xf32>
    %c0_21 = arith.constant 0 : index
    %c0_22 = arith.constant 0 : index
    %27 = vector.load %arg9[%c0_21, %c0_22] : memref<1x256xf32, #tpu.memory_space<vmem>>, vector<1x256xf32>
    %28 = vector.broadcast %27 : vector<1x256xf32> to vector<8x256xf32>
    %29 = arith.addf %26, %28 : vector<8x256xf32>
    %cst_23 = arith.constant 1.000000e-01 : f32
    %30 = vector.broadcast %cst_23 : f32 to vector<8x256xf32>
    %31 = arith.mulf %30, %29 : vector<8x256xf32>
    %32 = arith.maximumf %29, %31 : vector<8x256xf32>
    %c0_24 = arith.constant 0 : index
    %c0_25 = arith.constant 0 : index
    %33 = vector.load %arg10[%c0_24, %c0_25] : memref<256x128xf32, #tpu.memory_space<vmem>>, vector<256x128xf32>
    %cst_26 = arith.constant dense<0.000000e+00> : vector<8x128xf32>
    %34 = tpu.matmul %32, %33, %cst_26 {dimension_numbers = #tpu.dot_dimension_numbers<[1], [0], [0], [1], [0, 0, 1, 1], [], []>} : vector<8x256xf32>, vector<256x128xf32>, vector<8x128xf32> -> vector<8x128xf32>
    %c0_27 = arith.constant 0 : index
    %c0_28 = arith.constant 0 : index
    %35 = vector.load %arg11[%c0_27, %c0_28] : memref<1x128xf32, #tpu.memory_space<vmem>>, vector<1x128xf32>
    %36 = vector.broadcast %35 : vector<1x128xf32> to vector<8x128xf32>
    %37 = arith.addf %34, %36 : vector<8x128xf32>
    %c0_29 = arith.constant 0 : index
    %c0_30 = arith.constant 0 : index
    %38 = vector.load %arg12[%c0_29, %c0_30] : memref<8x128xf32, #tpu.memory_space<vmem>>, vector<8x128xf32>
    tpu.vector_store %arg12[%c0_29, %c0_30], %37 {strides = array<i32>} : memref<8x128xf32, #tpu.memory_space<vmem>>, vector<8x128xf32>,
    return
  }
  func.func @transform_0(%arg0: i32) -> (i32, i32) {
    %c0_i32 = arith.constant 0 : i32
    %c0_i32_0 = arith.constant 0 : i32
    return %arg0, %c0_i32 : i32, i32
  }
  func.func @transform_1(%arg0: i32) -> (i32, i32) {
    %c0_i32 = arith.constant 0 : i32
    %c0_i32_0 = arith.constant 0 : i32
    %c0_i32_1 = arith.constant 0 : i32
    return %c0_i32, %c0_i32_0 : i32, i32
  }
  func.func @transform_2(%arg0: i32) -> (i32, i32) {
    %c0_i32 = arith.constant 0 : i32
    %c0_i32_0 = arith.constant 0 : i32
    %c0_i32_1 = arith.constant 0 : i32
    return %c0_i32, %c0_i32_0 : i32, i32
  }
  func.func @transform_3(%arg0: i32) -> (i32, i32) {
    %c0_i32 = arith.constant 0 : i32
    %c0_i32_0 = arith.constant 0 : i32
    %c0_i32_1 = arith.constant 0 : i32
    return %c0_i32, %c0_i32_0 : i32, i32
  }
  func.func @transform_4(%arg0: i32) -> (i32, i32) {
    %c0_i32 = arith.constant 0 : i32
    %c0_i32_0 = arith.constant 0 : i32
    %c0_i32_1 = arith.constant 0 : i32
    return %c0_i32, %c0_i32_0 : i32, i32
  }
  func.func @transform_5(%arg0: i32) -> (i32, i32) {
    %c0_i32 = arith.constant 0 : i32
    %c0_i32_0 = arith.constant 0 : i32
    %c0_i32_1 = arith.constant 0 : i32
    return %c0_i32, %c0_i32_0 : i32, i32
  }
  func.func @transform_6(%arg0: i32) -> (i32, i32) {
    %c0_i32 = arith.constant 0 : i32
    %c0_i32_0 = arith.constant 0 : i32
    %c0_i32_1 = arith.constant 0 : i32
    return %c0_i32, %c0_i32_0 : i32, i32
  }
  func.func @transform_7(%arg0: i32) -> (i32, i32) {
    %c0_i32 = arith.constant 0 : i32
    %c0_i32_0 = arith.constant 0 : i32
    %c0_i32_1 = arith.constant 0 : i32
    return %c0_i32, %c0_i32_0 : i32, i32
  }
  func.func @transform_8(%arg0: i32) -> (i32, i32) {
    %c0_i32 = arith.constant 0 : i32
    %c0_i32_0 = arith.constant 0 : i32
    %c0_i32_1 = arith.constant 0 : i32
    return %c0_i32, %c0_i32_0 : i32, i32
  }
  func.func @transform_9(%arg0: i32) -> (i32, i32) {
    %c0_i32 = arith.constant 0 : i32
    %c0_i32_0 = arith.constant 0 : i32
    %c0_i32_1 = arith.constant 0 : i32
    return %c0_i32, %c0_i32_0 : i32, i32
  }
  func.func @transform_10(%arg0: i32) -> (i32, i32) {
    %c0_i32 = arith.constant 0 : i32
    %c0_i32_0 = arith.constant 0 : i32
    %c0_i32_1 = arith.constant 0 : i32
    return %c0_i32, %c0_i32_0 : i32, i32
  }
  func.func @transform_11(%arg0: i32) -> (i32, i32) {
    %c0_i32 = arith.constant 0 : i32
    %c0_i32_0 = arith.constant 0 : i32
    return %arg0, %c0_i32 : i32, i32
  }
}

</mosaic_0001>

<bundles_post_ra>
// kernel: tpu_custom_call.1
= control target key start
LH: loop header
LB: loop body
LE: loop exit
PB: predicated region body
PF: predicated region fallthrough
CT: control target
= control target key end

     0   :  { %16 = vsyncpa [#allocation3], 0  ;;  %s1979_s0 = inlined_call_operand.hbm [shape: f32[8,512], index: 0, kind: input, shape index: {}]   ;;  %s1980_s1 = inlined_call_operand.hbm [shape: f32[512,256], index: 1, kind: input, shape index: {}]   ;;  %s1981_s2 = inlined_call_operand.hbm [shape: f32[1,256], index: 2, kind: input, shape index: {}]   ;;  %s1982_s3 = inlined_call_operand.hbm [shape: f32[256,256], index: 3, kind: input, shape index: {}]   ;;  %s1983_s4 = inlined_call_operand.hbm [shape: f32[1,256], index: 4, kind: input, shape index: {}]   ;;  %s1984_s5 = inlined_call_operand.hbm [shape: f32[256,256], index: 5, kind: input, shape index: {}]   ;;  %s1985_s6 = inlined_call_operand.hbm [shape: f32[1,256], index: 6, kind: input, shape index: {}]   ;;  %s1986_s7 = inlined_call_operand.hbm [shape: f32[256,256], index: 7, kind: input, shape index: {}]   ;;  %s1987_s8 = inlined_call_operand.hbm [shape: f32[1,256], index: 8, kind: input, shape index: {}]   ;;  %s1988_s9 = inlined_call_operand.hbm [shape: f32[256,128], index: 9, kind: input, shape index: {}]   ;;  %s1989_s10 = inlined_call_operand.hbm [shape: f32[1,128], index: 10, kind: input, shape index: {}]   ;;  %s1990_s11 = inlined_call_operand.hbm [shape: f32[8,128], index: 11, kind: output, shape index: {}]  }
   0x1   :  { %17 = vsyncpa [#allocation6], 0 }
   0x2   :  { %18 = vsyncpa [#allocation9], 0 }
   0x3   :  { %19 = vsyncpa [#allocation12], 0 }
   0x4   :  { %20 = vsyncpa [#allocation15], 0 }
   0x5   :  { %21 = vsyncpa [#allocation18], 0 }
   0x6   :  { %22 = vsyncpa [#allocation4], 0  ;;  %s1735_s17 = smov [#allocation5]   ;;  %s1457_s21 = scalar_lea.hbm %s1980_s1, 16384 }
   0x7   :  { %s38_s18 = sshll.u32 %s1735_s17, 4  ;;  %p1458_p0 = scmp.ne.s32.totalorder %s1980_s1, %s1457_s21  ;;  %s39_s18 = int_to_ptr.vmem [resolvable:$true] %s38_s18 }
   0x8   :  { %p1461_p1 = scmp.lt.u32.totalorder %s1457_s21, %s1980_s1 }
   0xa   :  { %p1463_p2 = pnand %p1461_p1, %p1458_p0 }
   0xc   :  { %1466 = shalt.err (!%p1463_p2)
}
   0xd   :  { %s1467_s26 = scalar_lea.vmem %s39_s18, 16384  ;;  %p1472_p4 = scmp.lt.s32.totalorder %s39_s18, %s39_s18 }
   0xe   :  { %p1468_p3 = scmp.ne.s32.totalorder %s39_s18, %s1467_s26  ;;  %p1473_p5 = scmp.lt.s32.totalorder %s1467_s26, %s1467_s26 }
  0x10   :  { %p1474_p6 = por %p1473_p5, %p1472_p4 }
  0x12   :  { %p1475_p7 = pnand %p1474_p6, %p1468_p3 }
  0x14   :  { %1478 = shalt.err (!%p1475_p7)
}
  0x15   :  { %s1736_s27 = smov 256   ;;  %s1737_s28 = smov 16  }
  0x16   :  { %44 = dma.hbm_to_vmem [thread:$0]  %s1980_s1, 16384, %s39_s18, [#allocation6], %s1736_s27, %s1736_s27, %s1737_s28  }
  0x17   :  { %s1738_s12 = smov [#allocation8]   ;;  %s1739_s14 = smov [#allocation11]  }
  0x18   :  { %s60_s13 = sshll.u32 %s1738_s12, 4  ;;  %s82_s15 = sshll.u32 %s1739_s14, 4  ;;  %s61_s13 = int_to_ptr.vmem [resolvable:$true] %s60_s13  ;;  %s83_s15 = int_to_ptr.vmem [resolvable:$true] %s82_s15 }
  0x19   :  { %s1479_s19 = scalar_lea.hbm %s1982_s3, 8192 }
  0x1a   :  { %p1480_p8 = scmp.ne.s32.totalorder %s1982_s3, %s1479_s19  ;;  %p1483_p9 = scmp.lt.u32.totalorder %s1479_s19, %s1982_s3 }
  0x1c   :  { %p1485_p10 = pnand %p1483_p9, %p1480_p8 }
  0x1e   :  { %1488 = shalt.err (!%p1485_p10)
}
  0x1f   :  { %s1489_s1 = scalar_lea.vmem %s61_s13, 8192  ;;  %p1494_p12 = scmp.lt.s32.totalorder %s61_s13, %s61_s13 }
  0x20   :  { %p1490_p11 = scmp.ne.s32.totalorder %s61_s13, %s1489_s1  ;;  %p1495_p13 = scmp.lt.s32.totalorder %s1489_s1, %s1489_s1 }
  0x22   :  { %p1496_p0 = por %p1495_p13, %p1494_p12 }
  0x24   :  { %p1497_p1 = pnand %p1496_p0, %p1490_p11 }
  0x26   :  { %1500 = shalt.err (!%p1497_p1)
}
  0x27   :  { %66 = dma.hbm_to_vmem [thread:$0]  %s1982_s3, 8192, %s61_s13, [#allocation9], %s1736_s27, %s1736_s27, %s1737_s28  }
  0x28   :  { %s1501_s29 = scalar_lea.hbm %s1984_s5, 8192 }
  0x29   :  { %p1502_p2 = scmp.ne.s32.totalorder %s1984_s5, %s1501_s29  ;;  %p1505_p3 = scmp.lt.u32.totalorder %s1501_s29, %s1984_s5 }
  0x2b   :  { %p1507_p4 = pnand %p1505_p3, %p1502_p2 }
  0x2d   :  { %1510 = shalt.err (!%p1507_p4)
}
  0x2e   :  { %s1511_s17 = scalar_lea.vmem %s83_s15, 8192  ;;  %p1516_p6 = scmp.lt.s32.totalorder %s83_s15, %s83_s15 }
  0x2f   :  { %p1512_p5 = scmp.ne.s32.totalorder %s83_s15, %s1511_s17  ;;  %p1517_p7 = scmp.lt.s32.totalorder %s1511_s17, %s1511_s17 }
  0x31   :  { %p1518_p8 = por %p1517_p7, %p1516_p6 }
  0x33   :  { %p1519_p9 = pnand %p1518_p8, %p1512_p5 }
  0x35   :  { %1522 = shalt.err (!%p1519_p9)
}
  0x36   :  { %88 = dma.hbm_to_vmem [thread:$0]  %s1984_s5, 8192, %s83_s15, [#allocation12], %s1736_s27, %s1736_s27, %s1737_s28  }
  0x37   :  { %s1740_s19 = smov [#allocation14]   ;;  %s1741_s21 = smov [#allocation17]  }
  0x38   :  { %s104_s20 = sshll.u32 %s1740_s19, 4  ;;  %s126_s22 = sshll.u32 %s1741_s21, 4  ;;  %s105_s20 = int_to_ptr.vmem [resolvable:$true] %s104_s20  ;;  %s127_s22 = int_to_ptr.vmem [resolvable:$true] %s126_s22 }
  0x39   :  { %s1523_s18 = scalar_lea.hbm %s1986_s7, 8192 }
  0x3a   :  { %p1524_p10 = scmp.ne.s32.totalorder %s1986_s7, %s1523_s18  ;;  %p1527_p11 = scmp.lt.u32.totalorder %s1523_s18, %s1986_s7 }
  0x3c   :  { %p1529_p12 = pnand %p1527_p11, %p1524_p10 }
  0x3e   :  { %1532 = shalt.err (!%p1529_p12)
}
  0x3f   :  { %s1533_s5 = scalar_lea.vmem %s105_s20, 8192  ;;  %p1538_p0 = scmp.lt.s32.totalorder %s105_s20, %s105_s20 }
  0x40   :  { %p1534_p13 = scmp.ne.s32.totalorder %s105_s20, %s1533_s5  ;;  %p1539_p1 = scmp.lt.s32.totalorder %s1533_s5, %s1533_s5 }
  0x42   :  { %p1540_p2 = por %p1539_p1, %p1538_p0 }
  0x44   :  { %p1541_p3 = pnand %p1540_p2, %p1534_p13 }
  0x46   :  { %1544 = shalt.err (!%p1541_p3)
}
  0x47   :  { %110 = dma.hbm_to_vmem [thread:$0]  %s1986_s7, 8192, %s105_s20, [#allocation15], %s1736_s27, %s1736_s27, %s1737_s28  }
  0x48   :  { %s1545_s16 = scalar_lea.hbm %s1988_s9, 4096 }
  0x49   :  { %p1546_p4 = scmp.ne.s32.totalorder %s1988_s9, %s1545_s16  ;;  %p1549_p5 = scmp.lt.u32.totalorder %s1545_s16, %s1988_s9 }
  0x4b   :  { %p1551_p6 = pnand %p1549_p5, %p1546_p4 }
  0x4d   :  { %1554 = shalt.err (!%p1551_p6)
}
  0x4e   :  { %s1555_s21 = scalar_lea.vmem %s127_s22, 4096  ;;  %p1560_p8 = scmp.lt.s32.totalorder %s127_s22, %s127_s22 }
  0x4f   :  { %p1556_p7 = scmp.ne.s32.totalorder %s127_s22, %s1555_s21  ;;  %p1561_p9 = scmp.lt.s32.totalorder %s1555_s21, %s1555_s21 }
  0x51   :  { %p1562_p10 = por %p1561_p9, %p1560_p8 }
  0x53   :  { %p1563_p11 = pnand %p1562_p10, %p1556_p7 }
  0x55   :  { %1566 = shalt.err (!%p1563_p11)
}
  0x56   :  { %s1742_s7 = smov 128   ;;  %s1743_s27 = smov 8  }
  0x57   :  { %132 = dma.hbm_to_vmem [thread:$0]  %s1988_s9, 4096, %s127_s22, [#allocation18], %s1742_s7, %s1742_s7, %s1743_s27  }
  0x58   :  { %s1744_s23 = smov [#allocation2]   ;;  %s1745_s18 = smov [#allocation7]  }
  0x59   :  { %s29_s1 = sshll.u32 %s1744_s23, 4  ;;  %s51_s24 = sshll.u32 %s1745_s18, 4  ;;  %s30_s1 = int_to_ptr.vmem [resolvable:$true] %s29_s1  ;;  %s52_s24 = int_to_ptr.vmem [resolvable:$true] %s51_s24 }
  0x5a   :  { %s1567_s29 = scalar_lea.hbm %s1979_s0, 512 }
  0x5b   :  { %p1568_p12 = scmp.ne.s32.totalorder %s1979_s0, %s1567_s29  ;;  %p1571_p13 = scmp.lt.u32.totalorder %s1567_s29, %s1979_s0 }
  0x5d   :  { %p1573_p0 = pnand %p1571_p13, %p1568_p12 }
  0x5f   :  { %1576 = shalt.err (!%p1573_p0)
}
  0x60   :  { %s1577_s9 = scalar_lea.vmem %s30_s1, 512  ;;  %p1582_p2 = scmp.lt.s32.totalorder %s30_s1, %s30_s1 }
  0x61   :  { %p1578_p1 = scmp.ne.s32.totalorder %s30_s1, %s1577_s9  ;;  %p1583_p3 = scmp.lt.s32.totalorder %s1577_s9, %s1577_s9 }
  0x63   :  { %p1584_p4 = por %p1583_p3, %p1582_p2 }
  0x65   :  { %p1585_p5 = pnand %p1584_p4, %p1578_p1 }
  0x67   :  { %1588 = shalt.err (!%p1585_p5)
}
  0x68   :  { %32 = dma.hbm_to_vmem [thread:$0]  %s1979_s0, 512, %s30_s1, [#allocation3]  }
  0x69   :  { %s1589_s3 = scalar_lea.hbm %s1981_s2, 32 }
  0x6a   :  { %p1590_p6 = scmp.ne.s32.totalorder %s1981_s2, %s1589_s3  ;;  %p1593_p7 = scmp.lt.u32.totalorder %s1589_s3, %s1981_s2 }
  0x6c   :  { %p1595_p8 = pnand %p1593_p7, %p1590_p6 }
  0x6e   :  { %1598 = shalt.err (!%p1595_p8)
}
  0x6f   :  { %s1599_s27 = scalar_lea.vmem %s52_s24, 32  ;;  %p1604_p10 = scmp.lt.s32.totalorder %s52_s24, %s52_s24 }
  0x70   :  { %p1600_p9 = scmp.ne.s32.totalorder %s52_s24, %s1599_s27  ;;  %p1605_p11 = scmp.lt.s32.totalorder %s1599_s27, %s1599_s27 }
  0x72   :  { %p1606_p12 = por %p1605_p11, %p1604_p10 }
  0x74   :  { %p1607_p13 = pnand %p1606_p12, %p1600_p9 }
  0x76   :  { %1610 = shalt.err (!%p1607_p13)
}
  0x77   :  { %54 = dma.hbm_to_vmem [thread:$0]  %s1981_s2, 32, %s52_s24, [#allocation6]  }
  0x78   :  { %s1746_s20 = smov [#allocation10]   ;;  %s1747_s1 = smov [#allocation13]  }
  0x79   :  { %s73_s23 = sshll.u32 %s1746_s20, 4  ;;  %s95_s18 = sshll.u32 %s1747_s1, 4  ;;  %s74_s23 = int_to_ptr.vmem [resolvable:$true] %s73_s23  ;;  %s96_s18 = int_to_ptr.vmem [resolvable:$true] %s95_s18 }
  0x7a   :  { %s1611_s29 = scalar_lea.hbm %s1983_s4, 32 }
  0x7b   :  { %p1612_p0 = scmp.ne.s32.totalorder %s1983_s4, %s1611_s29  ;;  %p1615_p1 = scmp.lt.u32.totalorder %s1611_s29, %s1983_s4 }
  0x7d   :  { %p1617_p2 = pnand %p1615_p1, %p1612_p0 }
  0x7f   :  { %1620 = shalt.err (!%p1617_p2)
}
  0x80   :  { %s1621_s2 = scalar_lea.vmem %s74_s23, 32  ;;  %p1626_p4 = scmp.lt.s32.totalorder %s74_s23, %s74_s23 }
  0x81   :  { %p1622_p3 = scmp.ne.s32.totalorder %s74_s23, %s1621_s2  ;;  %p1627_p5 = scmp.lt.s32.totalorder %s1621_s2, %s1621_s2 }
  0x83   :  { %p1628_p6 = por %p1627_p5, %p1626_p4 }
  0x85   :  { %p1629_p7 = pnand %p1628_p6, %p1622_p3 }
  0x87   :  { %1632 = shalt.err (!%p1629_p7)
}
  0x88   :  { %76 = dma.hbm_to_vmem [thread:$0]  %s1983_s4, 32, %s74_s23, [#allocation9]  }
  0x89   :  { %s1633_s16 = scalar_lea.hbm %s1985_s6, 32 }
  0x8a   :  { %p1634_p8 = scmp.ne.s32.totalorder %s1985_s6, %s1633_s16  ;;  %p1637_p9 = scmp.lt.u32.totalorder %s1633_s16, %s1985_s6 }
  0x8c   :  { %p1639_p10 = pnand %p1637_p9, %p1634_p8 }
  0x8e   :  { %1642 = shalt.err (!%p1639_p10)
}
  0x8f   :  { %s1643_s21 = scalar_lea.vmem %s96_s18, 32  ;;  %p1648_p12 = scmp.lt.s32.totalorder %s96_s18, %s96_s18 }
  0x90   :  { %p1644_p11 = scmp.ne.s32.totalorder %s96_s18, %s1643_s21  ;;  %p1649_p13 = scmp.lt.s32.totalorder %s1643_s21, %s1643_s21 }
  0x92   :  { %p1650_p0 = por %p1649_p13, %p1648_p12 }
  0x94   :  { %p1651_p1 = pnand %p1650_p0, %p1644_p11 }
  0x96   :  { %1654 = shalt.err (!%p1651_p1)
}
  0x97   :  { %98 = dma.hbm_to_vmem [thread:$0]  %s1985_s6, 32, %s96_s18, [#allocation12]  }
  0x98   :  { %s1748_s27 = smov [#allocation16]   ;;  %s1749_s28 = smov [#allocation19]  }
  0x99   :  { %s117_s0 = sshll.u32 %s1748_s27, 4  ;;  %s139_s20 = sshll.u32 %s1749_s28, 4  ;;  %s118_s0 = int_to_ptr.vmem [resolvable:$true] %s117_s0  ;;  %s140_s20 = int_to_ptr.vmem [resolvable:$true] %s139_s20 }
  0x9a   :  { %s1655_s25 = scalar_lea.hbm %s1987_s8, 32 }
  0x9b   :  { %p1656_p2 = scmp.ne.s32.totalorder %s1987_s8, %s1655_s25  ;;  %p1659_p3 = scmp.lt.u32.totalorder %s1655_s25, %s1987_s8 }
  0x9d   :  { %p1661_p4 = pnand %p1659_p3, %p1656_p2 }
  0x9f   :  { %1664 = shalt.err (!%p1661_p4)
}
  0xa0   :  { %s1665_s6 = scalar_lea.vmem %s118_s0, 32  ;;  %p1670_p6 = scmp.lt.s32.totalorder %s118_s0, %s118_s0 }
  0xa1   :  { %p1666_p5 = scmp.ne.s32.totalorder %s118_s0, %s1665_s6  ;;  %p1671_p7 = scmp.lt.s32.totalorder %s1665_s6, %s1665_s6 }
  0xa3   :  { %p1672_p8 = por %p1671_p7, %p1670_p6 }
  0xa5   :  { %p1673_p9 = pnand %p1672_p8, %p1666_p5 }
  0xa7   :  { %1676 = shalt.err (!%p1673_p9)
}
  0xa8   :  { %120 = dma.hbm_to_vmem [thread:$0]  %s1987_s8, 32, %s118_s0, [#allocation15]  }
  0xa9   :  { %s1677_s24 = scalar_lea.hbm %s1989_s10, 16 }
  0xaa   :  { %p1678_p10 = scmp.ne.s32.totalorder %s1989_s10, %s1677_s24  ;;  %p1681_p11 = scmp.lt.u32.totalorder %s1677_s24, %s1989_s10 }
  0xac   :  { %p1683_p12 = pnand %p1681_p11, %p1678_p10 }
  0xae   :  { %1686 = shalt.err (!%p1683_p12)
}
  0xaf   :  { %s1687_s17 = scalar_lea.vmem %s140_s20, 16  ;;  %s1691_s3 = scalar_lea.vmem %s140_s20, 32 }
  0xb0   :  { %p1688_p13 = scmp.ne.s32.totalorder %s140_s20, %s1687_s17  ;;  %p1692_p0 = scmp.lt.s32.totalorder %s140_s20, %s140_s20 }
  0xb1   :  { %p1693_p1 = scmp.lt.s32.totalorder %s1691_s3, %s1687_s17 }
  0xb3   :  { %p1694_p2 = por %p1693_p1, %p1692_p0 }
  0xb5   :  { %p1695_p3 = pnand %p1694_p2, %p1688_p13 }
  0xb7   :  { %1698 = shalt.err (!%p1695_p3)
}
  0xb8   :  { %142 = dma.hbm_to_vmem [thread:$0]  %s1989_s10, 16, %s140_s20, [#allocation18]  }
  0xb9   :  { %1721 = dma.done.wait [#allocation3], 512  }
  0xba   :  { %1722 = vsyncadd [#allocation3], 4294966784 }
  0xbb   :  { %1723 = dma.done.wait [#allocation6], 16416  }
  0xbc   :  { %1724 = vsyncadd [#allocation6], 4294950880 }
  0xbd   :  { %1725 = dma.done.wait [#allocation9], 8224  }
  0xbe   :  { %1726 = vsyncadd [#allocation9], 4294959072 }
  0xbf   :  { %1727 = dma.done.wait [#allocation12], 8224  }
  0xc0   :  { %1728 = vsyncadd [#allocation12], 4294959072 }
  0xc1   :  { %1729 = dma.done.wait [#allocation15], 8224  }
  0xc2   :  { %1730 = vsyncadd [#allocation15], 4294959072 }
  0xc3   :  { %1731 = dma.done.wait [#allocation18], 4112  }
  0xc4   :  { %1732 = vsyncadd [#allocation18], 4294963184  ;;  %v181_v0 = vld [vmem:[#allocation5 + $0x8] sm:$0xff]  ;;  %v183_v1 = vld [vmem:[#allocation5 + $0x18] sm:$0xff]  ;;  %s1750_s10 = smov [#allocation20]  }
  0xc5   :  { %v180_v2 = vld [vmem:[#allocation5] sm:$0xff]  ;;  %v1085_v3 = vpack.c.bf16 %v183_v1, %v181_v0  ;;  %v182_v4 = vld [vmem:[#allocation5 + $0x10] sm:$0xff]  ;;  %v185_v5 = vld [vmem:[#allocation5 + $0x28] sm:$0xff]  ;;  %s1035_s19 = sshll.u32 %s1750_s10, 4  ;;  %s1036_s19 = int_to_ptr.vmem [resolvable:$true] %s1035_s19 }
  0xc6   :  { %v187_v6 = vld [vmem:[#allocation5 + $0x38] sm:$0xff]  ;;  %v1087_v7 = vpack.c.bf16 %v182_v4, %v180_v2  ;;  %v184_v9 = vld [vmem:[#allocation5 + $0x20] sm:$0xff]  ;;  %v186_v10 = vld [vmem:[#allocation5 + $0x30] sm:$0xff]  ;;  %s1699_s21 = scalar_lea.vmem %s1036_s19, 128  ;;  %p1704_p5 = scmp.lt.s32.totalorder %s1036_s19, %s1036_s19 }
  0xc7   :  { %v1089_v8 = vpack.c.bf16 %v187_v6, %v185_v5  ;;  %v189_v11 = vld [vmem:[#allocation5 + $0x48] sm:$0xff]  ;;  %1086 = vmatprep.subr.bf16.mxu0 %v1085_v3  ;;  %v191_v12 = vld [vmem:[#allocation5 + $0x58] sm:$0xff]  ;;  %v1091_v13 = vpack.c.bf16 %v186_v10, %v184_v9  ;;  %v188_v15 = vld [vmem:[#allocation5 + $0x40] sm:$0xff]  ;;  %p1700_p4 = scmp.ne.s32.totalorder %s1036_s19, %s1699_s21  ;;  %p1705_p6 = scmp.lt.s32.totalorder %s1699_s21, %s1699_s21 }
  0xc8   :  { %1088 = vmatpush1.bf16.msra.mxu0 %v1087_v7  ;;  %v1093_v14 = vpack.c.bf16 %v191_v12, %v189_v11  ;;  %v190_v16 = vld [vmem:[#allocation5 + $0x50] sm:$0xff]  ;;  %v193_v17 = vld [vmem:[#allocation5 + $0x68] sm:$0xff]  ;;  %v195_v18 = vld [vmem:[#allocation5 + $0x78] sm:$0xff] }
  0xc9   :  { %1090 = vmatprep.subr.bf16.mxu0 %v1089_v8  ;;  %v1095_v19 = vpack.c.bf16 %v190_v16, %v188_v15  ;;  %v1097_v20 = vpack.c.bf16 %v195_v18, %v193_v17  ;;  %v192_v21 = vld [vmem:[#allocation5 + $0x60] sm:$0xff]  ;;  %v194_v22 = vld [vmem:[#allocation5 + $0x70] sm:$0xff]  ;;  %v197_v23 = vld [vmem:[#allocation5 + $0x88] sm:$0xff]  ;;  %p1706_p7 = por %p1705_p6, %p1704_p5 }
  0xca   :  { %v199_v24 = vld [vmem:[#allocation5 + $0x98] sm:$0xff]  ;;  %v1099_v25 = vpack.c.bf16 %v194_v22, %v192_v21  ;;  %v196_v27 = vld [vmem:[#allocation5 + $0x80] sm:$0xff]  ;;  %v198_v28 = vld [vmem:[#allocation5 + $0x90] sm:$0xff] }
  0xcb   :  { %v1101_v26 = vpack.c.bf16 %v199_v24, %v197_v23  ;;  %v201_v29 = vld [vmem:[#allocation5 + $0xa8] sm:$0xff]  ;;  %v203_v30 = vld [vmem:[#allocation5 + $0xb8] sm:$0xff]  ;;  %v1103_v31 = vpack.c.bf16 %v198_v28, %v196_v27  ;;  %v200_v33 = vld [vmem:[#allocation5 + $0xa0] sm:$0xff]  ;;  %p1707_p8 = pnand %p1706_p7, %p1700_p4 }
  0xcc   :  { %1092 = vmatpush1.bf16.msra.mxu0 %v1091_v13  ;;  %v1105_v32 = vpack.c.bf16 %v203_v30, %v201_v29  ;;  %v202_v34 = vld [vmem:[#allocation5 + $0xb0] sm:$0xff]  ;;  %v205_v35 = vld [vmem:[#allocation5 + $0xc8] sm:$0xff]  ;;  %v207_v36 = vld [vmem:[#allocation5 + $0xd8] sm:$0xff] }
  0xcd   :  { %1094 = vmatprep.subr.bf16.mxu0 %v1093_v14  ;;  %v1107_v37 = vpack.c.bf16 %v202_v34, %v200_v33  ;;  %v1109_v38 = vpack.c.bf16 %v207_v36, %v205_v35  ;;  %v204_v39 = vld [vmem:[#allocation5 + $0xc0] sm:$0xff]  ;;  %v206_v40 = vld [vmem:[#allocation5 + $0xd0] sm:$0xff]  ;;  %v177_v41 = vld [vmem:[#allocation2 + $0x8] sm:$0xff] }
  0xce   :  { %v209_v42 = vld [vmem:[#allocation5 + $0xe8] sm:$0xff]  ;;  %v211_v43 = vld [vmem:[#allocation5 + $0xf8] sm:$0xff]  ;;  %384 = vmatprep.mubr.f32.mxu0 %v177_v41  ;;  %v1111_v44 = vpack.c.bf16 %v206_v40, %v204_v39  ;;  %v208_v46 = vld [vmem:[#allocation5 + $0xe0] sm:$0xff] }
  0xcf   :  { %v1113_v45 = vpack.c.bf16 %v211_v43, %v209_v42  ;;  %v210_v47 = vld [vmem:[#allocation5 + $0xf0] sm:$0xff]  ;;  %v213_v48 = vld [vmem:[#allocation5 + $0x108] sm:$0xff]  ;;  %v215_v49 = vld [vmem:[#allocation5 + $0x118] sm:$0xff] }
  0xd0   :  { %1096 = vmatpush1.bf16.msra.mxu0 %v1095_v19  ;;  %v1115_v50 = vpack.c.bf16 %v210_v47, %v208_v46  ;;  %v1117_v51 = vpack.c.bf16 %v215_v49, %v213_v48  ;;  %v212_v52 = vld [vmem:[#allocation5 + $0x100] sm:$0xff]  ;;  %v214_v53 = vld [vmem:[#allocation5 + $0x110] sm:$0xff]  ;;  %v217_v54 = vld [vmem:[#allocation5 + $0x128] sm:$0xff] }
  0xd1   :  { %1098 = vmatprep.subr.bf16.mxu0 %v1097_v20  ;;  %v219_v55 = vld [vmem:[#allocation5 + $0x138] sm:$0xff]  ;;  %v1119_v56 = vpack.c.bf16 %v214_v53, %v212_v52  ;;  %v216_v58 = vld [vmem:[#allocation5 + $0x120] sm:$0xff]  ;;  %v218_v59 = vld [vmem:[#allocation5 + $0x130] sm:$0xff] }
  0xd2   :  { %v1121_v57 = vpack.c.bf16 %v219_v55, %v217_v54  ;;  %v221_v60 = vld [vmem:[#allocation5 + $0x148] sm:$0xff]  ;;  %v223_v61 = vld [vmem:[#allocation5 + $0x158] sm:$0xff]  ;;  %v1123_v62 = vpack.c.bf16 %v218_v59, %v216_v58  ;;  %v220_v0 = vld [vmem:[#allocation5 + $0x140] sm:$0xff] }
  0xd3   :  { %v1125_v63 = vpack.c.bf16 %v223_v61, %v221_v60  ;;  %v222_v1 = vld [vmem:[#allocation5 + $0x150] sm:$0xff]  ;;  %v225_v2 = vld [vmem:[#allocation5 + $0x168] sm:$0xff]  ;;  %v227_v3 = vld [vmem:[#allocation5 + $0x178] sm:$0xff] }
  0xd4   :  { %1100 = vmatpush1.bf16.msra.mxu0 %v1099_v25  ;;  %v1127_v4 = vpack.c.bf16 %v222_v1, %v220_v0  ;;  %v1129_v5 = vpack.c.bf16 %v227_v3, %v225_v2  ;;  %v224_v6 = vld [vmem:[#allocation5 + $0x160] sm:$0xff]  ;;  %v226_v7 = vld [vmem:[#allocation5 + $0x170] sm:$0xff]  ;;  %v229_v8 = vld [vmem:[#allocation5 + $0x188] sm:$0xff] }
  0xd5   :  { %1102 = vmatprep.subr.bf16.mxu0 %v1101_v26  ;;  %v231_v9 = vld [vmem:[#allocation5 + $0x198] sm:$0xff]  ;;  %v228_v10 = vld [vmem:[#allocation5 + $0x180] sm:$0xff]  ;;  %v230_v11 = vld [vmem:[#allocation5 + $0x190] sm:$0xff]  ;;  %v1131_v12 = vpack.c.bf16 %v226_v7, %v224_v6 }
  0xd6   :  { %v233_v13 = vld [vmem:[#allocation5 + $0x1a8] sm:$0xff]  ;;  %v235_v14 = vld [vmem:[#allocation5 + $0x1b8] sm:$0xff]  ;;  %v1133_v18 = vpack.c.bf16 %v231_v9, %v229_v8  ;;  %v1135_v29 = vpack.c.bf16 %v230_v11, %v228_v10  ;;  %v232_v30 = vld [vmem:[#allocation5 + $0x1a0] sm:$0xff] }
  0xd7   :  { %v467_v15 = vld [vmem:[#allocation8 + $0x8] sm:$0xff]  ;;  %v469_v16 = vld [vmem:[#allocation8 + $0x18] sm:$0xff]  ;;  %v466_v17 = vld [vmem:[#allocation8] sm:$0xff]  ;;  %v1137_v33 = vpack.c.bf16 %v235_v14, %v233_v13 }
  0xd8   :  { %1104 = vmatpush1.bf16.msra.mxu0 %v1103_v31  ;;  %v1213_v19 = vpack.c.bf16 %v469_v16, %v467_v15  ;;  %v468_v20 = vld [vmem:[#allocation8 + $0x10] sm:$0xff]  ;;  %v471_v21 = vld [vmem:[#allocation8 + $0x28] sm:$0xff]  ;;  %v473_v22 = vld [vmem:[#allocation8 + $0x38] sm:$0xff] }
  0xd9   :  { %1106 = vmatprep.subr.bf16.mxu0 %v1105_v32  ;;  %v1215_v23 = vpack.c.bf16 %v468_v20, %v466_v17  ;;  %v1217_v24 = vpack.c.bf16 %v473_v22, %v471_v21  ;;  %v470_v25 = vld [vmem:[#allocation8 + $0x20] sm:$0xff]  ;;  %v472_v26 = vld [vmem:[#allocation8 + $0x30] sm:$0xff]  ;;  %v475_v27 = vld [vmem:[#allocation8 + $0x48] sm:$0xff] }
  0xda   :  { %1214 = vmatprep.subr.bf16.mxu1 %v1213_v19  ;;  %v477_v28 = vld [vmem:[#allocation8 + $0x58] sm:$0xff]  ;;  %v234_v31 = vld [vmem:[#allocation5 + $0x1b0] sm:$0xff]  ;;  %v1219_v32 = vpack.c.bf16 %v472_v26, %v470_v25  ;;  %v237_v34 = vld [vmem:[#allocation5 + $0x1c8] sm:$0xff] }
  0xdb   :  { %1216 = vmatpush1.bf16.msra.mxu1 %v1215_v23  ;;  %v1221_v35 = vpack.c.bf16 %v477_v28, %v475_v27  ;;  %v474_v36 = vld [vmem:[#allocation8 + $0x40] sm:$0xff]  ;;  %v479_v39 = vld [vmem:[#allocation8 + $0x68] sm:$0xff]  ;;  %v481_v40 = vld [vmem:[#allocation8 + $0x78] sm:$0xff]  ;;  %v1139_v41 = vpack.c.bf16 %v234_v31, %v232_v30 }
  0xdc   :  { %1108 = vmatpush1.bf16.msra.mxu0 %v1107_v37  ;;  %1218 = vmatprep.subr.bf16.mxu1 %v1217_v24  ;;  %v476_v37 = vld [vmem:[#allocation8 + $0x50] sm:$0xff]  ;;  %v236_v42 = vld [vmem:[#allocation5 + $0x1c0] sm:$0xff]  ;;  %v241_v46 = vld [vmem:[#allocation5 + $0x1e8] sm:$0xff]  ;;  %v1225_v47 = vpack.c.bf16 %v481_v40, %v479_v39 }
  0xdd   :  { %1110 = vmatprep.subr.bf16.mxu0 %v1109_v38  ;;  %v239_v38 = vld [vmem:[#allocation5 + $0x1d8] sm:$0xff]  ;;  %v238_v43 = vld [vmem:[#allocation5 + $0x1d0] sm:$0xff]  ;;  %v478_v48 = vld [vmem:[#allocation8 + $0x60] sm:$0xff] }
  0xde   :  { %v480_v49 = vld [vmem:[#allocation8 + $0x70] sm:$0xff]  ;;  %v485_v52 = vld [vmem:[#allocation8 + $0x98] sm:$0xff]  ;;  %v1143_v53 = vpack.c.bf16 %v238_v43, %v236_v42  ;;  %v245_v58 = vld [vmem:[#allocation5 + $0x208] sm:$0xff] }
  0xdf   :  { %1220 = vmatpush1.bf16.msra.mxu1 %v1219_v32  ;;  %v240_v54 = vld [vmem:[#allocation5 + $0x1e0] sm:$0xff]  ;;  %v242_v55 = vld [vmem:[#allocation5 + $0x1f0] sm:$0xff]  ;;  %v249_v6 = vld [vmem:[#allocation5 + $0x228] sm:$0xff] }
  0xe0   :  { %1112 = vmatpush1.bf16.msra.mxu0 %v1111_v44  ;;  %v1223_v44 = vpack.c.bf16 %v476_v37, %v474_v36  ;;  %1222 = vmatprep.subr.bf16.mxu1 %v1221_v35  ;;  %v482_v60 = vld [vmem:[#allocation8 + $0x80] sm:$0xff]  ;;  %v484_v61 = vld [vmem:[#allocation8 + $0x90] sm:$0xff]  ;;  %v489_v0 = vld [vmem:[#allocation8 + $0xb8] sm:$0xff]  ;;  %v1147_v1 = vpack.c.bf16 %v242_v55, %v240_v54 }
  0xe1   :  { %1114 = vmatprep.subr.bf16.mxu0 %v1113_v45  ;;  %v1141_v45 = vpack.c.bf16 %v239_v38, %v237_v34  ;;  %v1231_v2 = vpack.c.bf16 %v484_v61, %v482_v60  ;;  %v251_v8 = vld [vmem:[#allocation5 + $0x238] sm:$0xff]  ;;  %v486_v9 = vld [vmem:[#allocation8 + $0xa0] sm:$0xff]  ;;  %v491_v11 = vld [vmem:[#allocation8 + $0xc8] sm:$0xff] }
  0xe2   :  { %v488_v10 = vld [vmem:[#allocation8 + $0xb0] sm:$0xff]  ;;  %v176_v13 = vld [vmem:[#allocation2] sm:$0xff]  ;;  %v1153_v16 = vpack.c.bf16 %v251_v8, %v249_v6  ;;  %v495_v25 = vld [vmem:[#allocation8 + $0xe8] sm:$0xff] }
  0xe3   :  { %1224 = vmatpush1.bf16.msra.mxu1 %v1223_v44  ;;  %v248_v15 = vld [vmem:[#allocation5 + $0x220] sm:$0xff]  ;;  %v250_v17 = vld [vmem:[#allocation5 + $0x230] sm:$0xff]  ;;  %v179_v19 = vld [vmem:[#allocation2 + $0x18] sm:$0xff]  ;;  %v1235_v20 = vpack.c.bf16 %v488_v10, %v486_v9 }
  0xe4   :  { %1116 = vmatpush1.bf16.msra.mxu0 %v1115_v50  ;;  %v243_v50 = vld [vmem:[#allocation5 + $0x1f8] sm:$0xff]  ;;  %1226 = vmatprep.subr.bf16.mxu1 %v1225_v47  ;;  %v490_v23 = vld [vmem:[#allocation8 + $0xc0] sm:$0xff]  ;;  %v1155_v27 = vpack.c.bf16 %v250_v17, %v248_v15  ;;  %v254_v30 = vld [vmem:[#allocation5 + $0x250] sm:$0xff] }
  0xe5   :  { %1118 = vmatprep.subr.bf16.mxu0 %v1117_v51  ;;  %v483_v51 = vld [vmem:[#allocation8 + $0x88] sm:$0xff]  ;;  %v255_v21 = vld [vmem:[#allocation5 + $0x258] sm:$0xff]  ;;  %v494_v35 = vld [vmem:[#allocation8 + $0xe0] sm:$0xff] }
  0xe6   :  { %v1229_v59 = vpack.c.bf16 %v485_v52, %v483_v51  ;;  %v492_v24 = vld [vmem:[#allocation8 + $0xd0] sm:$0xff]  ;;  %v497_v26 = vld [vmem:[#allocation8 + $0xf8] sm:$0xff]  ;;  %v257_v31 = vld [vmem:[#allocation5 + $0x268] sm:$0xff] }
  0xe7   :  { %v1239_v32 = vpack.c.bf16 %v492_v24, %v490_v23  ;;  %v1241_v34 = vpack.c.bf16 %v497_v26, %v495_v25  ;;  %v496_v36 = vld [vmem:[#allocation8 + $0xf0] sm:$0xff]  ;;  %v499_v37 = vld [vmem:[#allocation8 + $0x108] sm:$0xff]  ;;  %v501_v38 = vld [vmem:[#allocation8 + $0x118] sm:$0xff] }
  0xe8   :  { %1120 = vmatpush1.bf16.msra.mxu0 %v1119_v56  ;;  %v1227_v56 = vpack.c.bf16 %v480_v49, %v478_v48  ;;  %v258_v42 = vld [vmem:[#allocation5 + $0x270] sm:$0xff]  ;;  %v261_v43 = vld [vmem:[#allocation5 + $0x288] sm:$0xff]  ;;  %v1243_v44 = vpack.c.bf16 %v496_v36, %v494_v35  ;;  %v513_v10 = vld [vmem:[#allocation8 + $0x178] sm:$0xff] }
  0xe9   :  { %1122 = vmatprep.subr.bf16.mxu0 %v1121_v57  ;;  %v1145_v57 = vpack.c.bf16 %v243_v50, %v241_v46  ;;  %v1245_v46 = vpack.c.bf16 %v501_v38, %v499_v37  ;;  %v498_v47 = vld [vmem:[#allocation8 + $0x100] sm:$0xff]  ;;  %v500_v48 = vld [vmem:[#allocation8 + $0x110] sm:$0xff]  ;;  %v503_v49 = vld [vmem:[#allocation8 + $0x128] sm:$0xff] }
  0xea   :  { %1228 = vmatpush1.bf16.msra.mxu1 %v1227_v56  ;;  %v505_v50 = vld [vmem:[#allocation8 + $0x138] sm:$0xff]  ;;  %v262_v54 = vld [vmem:[#allocation5 + $0x290] sm:$0xff]  ;;  %v265_v55 = vld [vmem:[#allocation5 + $0x2a8] sm:$0xff]  ;;  %v1247_v56 = vpack.c.bf16 %v500_v48, %v498_v47 }
  0xeb   :  { %1230 = vmatprep.subr.bf16.mxu1 %v1229_v59  ;;  %v502_v59 = vld [vmem:[#allocation8 + $0x120] sm:$0xff]  ;;  %v504_v60 = vld [vmem:[#allocation8 + $0x130] sm:$0xff]  ;;  %v507_v61 = vld [vmem:[#allocation8 + $0x148] sm:$0xff] }
  0xec   :  { %1124 = vmatpush1.bf16.msra.mxu0 %v1123_v62  ;;  %v247_v62 = vld [vmem:[#allocation5 + $0x218] sm:$0xff]  ;;  %v511_v9 = vld [vmem:[#allocation8 + $0x168] sm:$0xff]  ;;  %v272_v25 = vld [vmem:[#allocation5 + $0x2e0] sm:$0xff] }
  0xed   :  { %1126 = vmatprep.subr.bf16.mxu0 %v1125_v63  ;;  %v487_v63 = vld [vmem:[#allocation8 + $0xa8] sm:$0xff]  ;;  %v1149_v3 = vpack.c.bf16 %v247_v62, %v245_v58  ;;  %v1249_v58 = vpack.c.bf16 %v505_v50, %v503_v49  ;;  %v509_v62 = vld [vmem:[#allocation8 + $0x158] sm:$0xff]  ;;  %v508_v8 = vld [vmem:[#allocation8 + $0x150] sm:$0xff] }
  0xee   :  { %v1233_v7 = vpack.c.bf16 %v489_v0, %v487_v63  ;;  %1232 = vmatpush1.bf16.msra.mxu1 %v1231_v2  ;;  %v266_v2 = vld [vmem:[#allocation5 + $0x2b0] sm:$0xff]  ;;  %v1253_v6 = vpack.c.bf16 %v509_v62, %v507_v61  ;;  %v273_v15 = vld [vmem:[#allocation5 + $0x2e8] sm:$0xff]  ;;  %v275_v17 = vld [vmem:[#allocation5 + $0x2f8] sm:$0xff] }
  0xef   :  { %v1177_v24 = vpack.c.bf16 %v275_v17, %v273_v15  ;;  %v274_v26 = vld [vmem:[#allocation5 + $0x2f0] sm:$0xff]  ;;  %v276_v37 = vld [vmem:[#allocation5 + $0x300] sm:$0xff]  ;;  %v285_v50 = vld [vmem:[#allocation5 + $0x348] sm:$0xff] }
  0xf0   :  { %1128 = vmatpush1.bf16.msra.mxu0 %v1127_v4  ;;  %v244_v4 = vld [vmem:[#allocation5 + $0x200] sm:$0xff]  ;;  %1234 = vmatprep.subr.bf16.mxu1 %v1233_v7  ;;  %v1179_v35 = vpack.c.bf16 %v274_v26, %v272_v25  ;;  %v278_v38 = vld [vmem:[#allocation5 + $0x310] sm:$0xff]  ;;  %v293_v62 = vld [vmem:[#allocation5 + $0x388] sm:$0xff] }
  0xf1   :  { %1130 = vmatprep.subr.bf16.mxu0 %v1129_v5  ;;  %v246_v5 = vld [vmem:[#allocation5 + $0x210] sm:$0xff]  ;;  %v506_v7 = vld [vmem:[#allocation8 + $0x140] sm:$0xff]  ;;  %v307_v17 = vld [vmem:[#allocation5 + $0x3f8] sm:$0xff] }
  0xf2   :  { %v1151_v14 = vpack.c.bf16 %v246_v5, %v244_v4  ;;  %1236 = vmatpush1.bf16.msra.mxu1 %v1235_v20  ;;  %v1251_v4 = vpack.c.bf16 %v504_v60, %v502_v59  ;;  %v271_v5 = vld [vmem:[#allocation5 + $0x2d8] sm:$0xff]  ;;  %v280_v47 = vld [vmem:[#allocation5 + $0x320] sm:$0xff]  ;;  %v282_v48 = vld [vmem:[#allocation5 + $0x330] sm:$0xff] }
  0xf3   :  { %v512_v20 = vld [vmem:[#allocation8 + $0x170] sm:$0xff]  ;;  %v288_v60 = vld [vmem:[#allocation5 + $0x360] sm:$0xff] }
  0xf4   :  { %1132 = vmatpush1.bf16.msra.mxu0 %v1131_v12  ;;  %v493_v12 = vld [vmem:[#allocation8 + $0xd8] sm:$0xff]  ;;  %v290_v61 = vld [vmem:[#allocation5 + $0x370] sm:$0xff] }
  0xf5   :  { %1134 = vmatprep.subr.bf16.mxu0 %v1133_v18  ;;  %v253_v18 = vld [vmem:[#allocation5 + $0x248] sm:$0xff]  ;;  %v1237_v22 = vpack.c.bf16 %v493_v12, %v491_v11  ;;  %v302_v15 = vld [vmem:[#allocation5 + $0x3d0] sm:$0xff]  ;;  %v525_v25 = vld [vmem:[#allocation8 + $0x1d8] sm:$0xff] }
  0xf6   :  { %v1157_v28 = vpack.c.bf16 %v255_v21, %v253_v18  ;;  %v1257_v18 = vpack.c.bf16 %v513_v10, %v511_v9  ;;  %v515_v21 = vld [vmem:[#allocation8 + $0x188] sm:$0xff] }
  0xf7   :  { %1238 = vmatprep.subr.bf16.mxu1 %v1237_v22  ;;  %v517_v22 = vld [vmem:[#allocation8 + $0x198] sm:$0xff]  ;;  %v298_v9 = vld [vmem:[#allocation5 + $0x3b0] sm:$0xff]  ;;  %v301_v10 = vld [vmem:[#allocation5 + $0x3c8] sm:$0xff] }
  0xf8   :  { %1136 = vmatpush1.bf16.msra.mxu0 %v1135_v29  ;;  %v252_v29 = vld [vmem:[#allocation5 + $0x240] sm:$0xff]  ;;  %1240 = vmatpush1.bf16.msra.mxu1 %v1239_v32  ;;  %v516_v32 = vld [vmem:[#allocation8 + $0x190] sm:$0xff] }
  0xf9   :  { %1138 = vmatprep.subr.bf16.mxu0 %v1137_v33  ;;  %v259_v33 = vld [vmem:[#allocation5 + $0x278] sm:$0xff]  ;;  %v1159_v39 = vpack.c.bf16 %v254_v30, %v252_v29  ;;  %1242 = vmatprep.subr.bf16.mxu1 %v1241_v34  ;;  %v1261_v30 = vpack.c.bf16 %v517_v22, %v515_v21  ;;  %v306_v21 = vld [vmem:[#allocation5 + $0x3f0] sm:$0xff] }
  0xfa   :  { %v1161_v40 = vpack.c.bf16 %v259_v33, %v257_v31  ;;  %v279_v29 = vld [vmem:[#allocation5 + $0x318] sm:$0xff]  ;;  %v514_v31 = vld [vmem:[#allocation8 + $0x180] sm:$0xff]  ;;  %v519_v33 = vld [vmem:[#allocation8 + $0x1a8] sm:$0xff] }
  0xfb   :  { %v521_v34 = vld [vmem:[#allocation8 + $0x1b8] sm:$0xff] }
  0xfc   :  { %1140 = vmatpush1.bf16.msra.mxu0 %v1139_v41  ;;  %v256_v41 = vld [vmem:[#allocation5 + $0x260] sm:$0xff]  ;;  %1244 = vmatpush1.bf16.msra.mxu1 %v1243_v44  ;;  %v520_v44 = vld [vmem:[#allocation8 + $0x1b0] sm:$0xff] }
  0xfd   :  { %1142 = vmatprep.subr.bf16.mxu0 %v1141_v45  ;;  %v263_v45 = vld [vmem:[#allocation5 + $0x298] sm:$0xff]  ;;  %v1163_v51 = vpack.c.bf16 %v258_v42, %v256_v41  ;;  %1246 = vmatprep.subr.bf16.mxu1 %v1245_v46  ;;  %v1265_v42 = vpack.c.bf16 %v521_v34, %v519_v33  ;;  %v526_v33 = vld [vmem:[#allocation8 + $0x1e0] sm:$0xff] }
  0xfe   :  { %v1165_v52 = vpack.c.bf16 %v263_v45, %v261_v43  ;;  %v283_v41 = vld [vmem:[#allocation5 + $0x338] sm:$0xff]  ;;  %v518_v43 = vld [vmem:[#allocation8 + $0x1a0] sm:$0xff]  ;;  %v1183_v45 = vpack.c.bf16 %v278_v38, %v276_v37 }
  0xff   :  { %v1267_v49 = vpack.c.bf16 %v520_v44, %v518_v43  ;;  %v528_v34 = vld [vmem:[#allocation8 + $0x1f0] sm:$0xff]  ;;  %v620_v37 = vld [vmem:[#allocation11 + $0x18] sm:$0xff] }
 0x100   :  { %1144 = vmatpush1.bf16.msra.mxu0 %v1143_v53  ;;  %v260_v53 = vld [vmem:[#allocation5 + $0x280] sm:$0xff]  ;;  %1248 = vmatpush1.bf16.msra.mxu1 %v1247_v56  ;;  %v289_v56 = vld [vmem:[#allocation5 + $0x368] sm:$0xff] }
 0x101   :  { %1146 = vmatprep.subr.bf16.mxu0 %v1145_v57  ;;  %v267_v57 = vld [vmem:[#allocation5 + $0x2b8] sm:$0xff]  ;;  %v1167_v63 = vpack.c.bf16 %v262_v54, %v260_v53  ;;  %1250 = vmatprep.subr.bf16.mxu1 %v1249_v58  ;;  %v284_v54 = vld [vmem:[#allocation5 + $0x340] sm:$0xff] }
 0x102   :  { %v1169_v0 = vpack.c.bf16 %v267_v57, %v265_v55  ;;  %v286_v55 = vld [vmem:[#allocation5 + $0x350] sm:$0xff]  ;;  %v291_v57 = vld [vmem:[#allocation5 + $0x378] sm:$0xff] }
 0x103   :  { %v1191_v58 = vpack.c.bf16 %v286_v55, %v284_v54  ;;  %v1193_v59 = vpack.c.bf16 %v291_v57, %v289_v56  ;;  %v622_v54 = vld [vmem:[#allocation11 + $0x28] sm:$0xff]  ;;  %v624_v55 = vld [vmem:[#allocation11 + $0x38] sm:$0xff] }
 0x104   :  { %1148 = vmatpush1.bf16.msra.mxu0 %v1147_v1  ;;  %v264_v1 = vld [vmem:[#allocation5 + $0x2a0] sm:$0xff]  ;;  %1252 = vmatpush1.bf16.msra.mxu1 %v1251_v4  ;;  %v297_v4 = vld [vmem:[#allocation5 + $0x3a8] sm:$0xff] }
 0x105   :  { %1150 = vmatprep.subr.bf16.mxu0 %v1149_v3  ;;  %v269_v3 = vld [vmem:[#allocation5 + $0x2c8] sm:$0xff]  ;;  %v1171_v11 = vpack.c.bf16 %v266_v2, %v264_v1  ;;  %1254 = vmatprep.subr.bf16.mxu1 %v1253_v6  ;;  %v292_v2 = vld [vmem:[#allocation5 + $0x380] sm:$0xff] }
 0x106   :  { %v1173_v12 = vpack.c.bf16 %v271_v5, %v269_v3  ;;  %v294_v3 = vld [vmem:[#allocation5 + $0x390] sm:$0xff]  ;;  %v299_v5 = vld [vmem:[#allocation5 + $0x3b8] sm:$0xff] }
 0x107   :  { %385 = vmatmul.mubr.f32.vlgmr.msra.gmra.mrb[0].mxu0 %v176_v13  ;;  %v268_v13 = vld [vmem:[#allocation5 + $0x2c0] sm:$0xff]  ;;  %v1199_v6 = vpack.c.bf16 %v294_v3, %v292_v2  ;;  %v627_v3 = vld [vmem:[#allocation11 + $0x50] sm:$0xff] }
 0x108   :  { %1152 = vmatpush1.bf16.msra.mxu0 %v1151_v14  ;;  %455 = vmatprep.mubr.f32.mxu0 %v179_v19  ;;  %v270_v14 = vld [vmem:[#allocation5 + $0x2d0] sm:$0xff]  ;;  %v510_v19 = vld [vmem:[#allocation8 + $0x160] sm:$0xff] }
 0x109   :  { %1154 = vmatprep.subr.bf16.mxu0 %v1153_v16  ;;  %v1255_v16 = vpack.c.bf16 %v508_v8, %v506_v7  ;;  %v1175_v23 = vpack.c.bf16 %v270_v14, %v268_v13  ;;  %v1201_v7 = vpack.c.bf16 %v299_v5, %v297_v4  ;;  %v296_v8 = vld [vmem:[#allocation5 + $0x3a0] sm:$0xff]  ;;  %v630_v4 = vld [vmem:[#allocation11 + $0x68] sm:$0xff] }
 0x10a   :  { %v300_v14 = vld [vmem:[#allocation5 + $0x3c0] sm:$0xff] }
 0x10b   :  { %1256 = vmatpush1.bf16.msra.mxu1 %v1255_v16  ;;  %v305_v16 = vld [vmem:[#allocation5 + $0x3e8] sm:$0xff]  ;;  %v632_v5 = vld [vmem:[#allocation11 + $0x78] sm:$0xff] }
 0x10c   :  { %1156 = vmatpush1.bf16.msra.mxu0 %v1155_v27  ;;  %v277_v27 = vld [vmem:[#allocation5 + $0x308] sm:$0xff]  ;;  %1258 = vmatprep.subr.bf16.mxu1 %v1257_v18  ;;  %v1207_v18 = vpack.c.bf16 %v302_v15, %v300_v14  ;;  %v635_v15 = vld [vmem:[#allocation11 + $0x90] sm:$0xff] }
 0x10d   :  { %1158 = vmatprep.subr.bf16.mxu0 %v1157_v28  ;;  %v1259_v28 = vpack.c.bf16 %v512_v20, %v510_v19  ;;  %v1181_v36 = vpack.c.bf16 %v279_v29, %v277_v27  ;;  %v1209_v19 = vpack.c.bf16 %v307_v17, %v305_v16  ;;  %v304_v20 = vld [vmem:[#allocation5 + $0x3e0] sm:$0xff]  ;;  %v638_v16 = vld [vmem:[#allocation11 + $0xa8] sm:$0xff] }
 0x10e   :  { %v1211_v22 = vpack.c.bf16 %v306_v21, %v304_v20  ;;  %v522_v27 = vld [vmem:[#allocation8 + $0x1c0] sm:$0xff]  ;;  %v639_v21 = vld [vmem:[#allocation11 + $0xb0] sm:$0xff] }
 0x10f   :  { %1260 = vmatpush1.bf16.msra.mxu1 %v1259_v28  ;;  %v524_v28 = vld [vmem:[#allocation8 + $0x1d0] sm:$0xff]  ;;  %v625_v2 = vld [vmem:[#allocation11 + $0x40] sm:$0xff]  ;;  %v640_v17 = vld [vmem:[#allocation11 + $0xb8] sm:$0xff] }
 0x110   :  { %1160 = vmatpush1.bf16.msra.mxu0 %v1159_v39  ;;  %v281_v39 = vld [vmem:[#allocation5 + $0x328] sm:$0xff]  ;;  %1262 = vmatprep.subr.bf16.mxu1 %v1261_v30  ;;  %v1271_v29 = vpack.c.bf16 %v524_v28, %v522_v27  ;;  %v643_v27 = vld [vmem:[#allocation11 + $0xd0] sm:$0xff] }
 0x111   :  { %1162 = vmatprep.subr.bf16.mxu0 %v1161_v40  ;;  %v1263_v40 = vpack.c.bf16 %v516_v32, %v514_v31  ;;  %v1185_v46 = vpack.c.bf16 %v283_v41, %v281_v39  ;;  %v527_v30 = vld [vmem:[#allocation8 + $0x1e8] sm:$0xff]  ;;  %v529_v31 = vld [vmem:[#allocation8 + $0x1f8] sm:$0xff]  ;;  %v310_v39 = vlaneseq }
 0x112   :  { %v1273_v32 = vpack.c.bf16 %v529_v31, %v527_v30  ;;  %v633_v14 = vld [vmem:[#allocation11 + $0x80] sm:$0xff]  ;;  %v646_v28 = vld [vmem:[#allocation11 + $0xe8] sm:$0xff] }
 0x113   :  { %1264 = vmatpush1.bf16.msra.mxu1 %v1263_v40  ;;  %v311_v40 = vshrl.u32 %v310_v39, 7  ;;  %v637_v20 = vld [vmem:[#allocation11 + $0xa0] sm:$0xff]  ;;  %v651_v39 = vld [vmem:[#allocation11 + $0x110] sm:$0xff] }
 0x114   :  { %1164 = vmatpush1.bf16.msra.mxu0 %v1163_v51  ;;  %v287_v51 = vld [vmem:[#allocation5 + $0x358] sm:$0xff]  ;;  %1266 = vmatprep.subr.bf16.mxu1 %v1265_v42  ;;  %v308_v42 = vld [vmem:[#allocation7] sm:$0x3] }
 0x115   :  { %1166 = vmatprep.subr.bf16.mxu0 %v1165_v52  ;;  %v1187_v52 = vpack.c.bf16 %v282_v48, %v280_v47  ;;  %v1189_v53 = vpack.c.bf16 %v287_v51, %v285_v50  ;;  %v1955_v41 = vsub.s32 0, %v311_v40  ;;  %v1957_v43 = vsub.s32 1, %v311_v40  ;;  %v617_v51 = vld [vmem:[#allocation11] sm:$0xff]  ;;  %v654_v40 = vld [vmem:[#allocation11 + $0x128] sm:$0xff] }
 0x117   :  { %1268 = vmatpush1.bf16.msra.mxu1 %v1267_v49  ;;  %v313_v44 = vrot.slane %v308_v42, %v1955_v41 }
 0x118   :  { %1168 = vmatpush1.bf16.msra.mxu0 %v1167_v63  ;;  %v295_v63 = vld [vmem:[#allocation5 + $0x398] sm:$0xff] }
 0x119   :  { %1170 = vmatprep.subr.bf16.mxu0 %v1169_v0  ;;  %v1195_v0 = vpack.c.bf16 %v290_v61, %v288_v60  ;;  %v1197_v1 = vpack.c.bf16 %v295_v63, %v293_v62  ;;  %v621_v60 = vld [vmem:[#allocation11 + $0x20] sm:$0xff]  ;;  %v623_v61 = vld [vmem:[#allocation11 + $0x30] sm:$0xff]  ;;  %v626_v62 = vld [vmem:[#allocation11 + $0x48] sm:$0xff] }
 0x11a   :  { %v628_v63 = vld [vmem:[#allocation11 + $0x58] sm:$0xff] }
 0x11c   :  { %1172 = vmatpush1.bf16.msra.mxu0 %v1171_v11  ;;  %v303_v11 = vld [vmem:[#allocation5 + $0x3d8] sm:$0xff] }
 0x11d   :  { %1174 = vmatprep.subr.bf16.mxu0 %v1173_v12  ;;  %v1203_v12 = vpack.c.bf16 %v298_v9, %v296_v8  ;;  %v1205_v13 = vpack.c.bf16 %v303_v11, %v301_v10  ;;  %v629_v8 = vld [vmem:[#allocation11 + $0x60] sm:$0xff]  ;;  %v631_v9 = vld [vmem:[#allocation11 + $0x70] sm:$0xff]  ;;  %v634_v10 = vld [vmem:[#allocation11 + $0x88] sm:$0xff] }
 0x11e   :  { %v636_v11 = vld [vmem:[#allocation11 + $0x98] sm:$0xff] }
 0x120   :  { %1176 = vmatpush1.bf16.msra.mxu0 %v1175_v23  ;;  %v178_v23 = vld [vmem:[#allocation2 + $0x10] sm:$0xff] }
 0x121   :  { %1178 = vmatprep.subr.bf16.mxu0 %v1177_v24  ;;  %v523_v24 = vld [vmem:[#allocation8 + $0x1c8] sm:$0xff] }
 0x122   :  { %v1269_v26 = vpack.c.bf16 %v525_v25, %v523_v24  ;;  %v1299_v24 = vpack.c.bf16 %v639_v21, %v637_v20  ;;  %v769_v21 = vld [vmem:[#allocation14 + $0x8] sm:$0xff] }
 0x124   :  { %1180 = vmatpush1.bf16.msra.mxu0 %v1179_v35  ;;  %1270 = vmatprep.subr.bf16.mxu1 %v1269_v26  ;;  %v1275_v35 = vpack.c.bf16 %v528_v34, %v526_v33  ;;  %v641_v26 = vld [vmem:[#allocation11 + $0xc0] sm:$0xff]  ;;  %v647_v33 = vld [vmem:[#allocation11 + $0xf0] sm:$0xff]  ;;  %v650_v34 = vld [vmem:[#allocation11 + $0x108] sm:$0xff] }
 0x125   :  { %1182 = vmatprep.subr.bf16.mxu0 %v1181_v36  ;;  %1272 = vmatpush1.bf16.msra.mxu1 %v1271_v29  ;;  %v618_v36 = vld [vmem:[#allocation11 + $0x8] sm:$0xff]  ;;  %v648_v29 = vld [vmem:[#allocation11 + $0xf8] sm:$0xff]  ;;  %v1303_v30 = vpack.c.bf16 %v643_v27, %v641_v26 }
 0x126   :  { %1274 = vmatprep.subr.bf16.mxu1 %v1273_v32  ;;  %v1277_v38 = vpack.c.bf16 %v620_v37, %v618_v36  ;;  %v1305_v31 = vpack.c.bf16 %v648_v29, %v646_v28  ;;  %v645_v32 = vld [vmem:[#allocation11 + $0xe0] sm:$0xff]  ;;  %v773_v26 = vld [vmem:[#allocation14 + $0x28] sm:$0xff] }
 0x127   :  { %v1307_v36 = vpack.c.bf16 %v647_v33, %v645_v32  ;;  %v775_v27 = vld [vmem:[#allocation14 + $0x38] sm:$0xff]  ;;  %v777_v32 = vld [vmem:[#allocation14 + $0x48] sm:$0xff] }
 0x128   :  { %1184 = vmatpush1.bf16.msra.mxu0 %v1183_v45  ;;  %v317_v45 = vrot.slane %v308_v42, %v1957_v43  ;;  %v656_v42 = vld [vmem:[#allocation11 + $0x138] sm:$0xff]  ;;  %v1345_v29 = vpack.c.bf16 %v775_v27, %v773_v26 }
 0x129   :  { %1186 = vmatprep.subr.bf16.mxu0 %v1185_v46  ;;  %1276 = vmatpush1.bf16.msra.mxu1 %v1275_v35  ;;  %v652_v35 = vld [vmem:[#allocation11 + $0x118] sm:$0xff] }
 0x12a   :  { %1278 = vmatprep.subr.bf16.mxu1 %v1277_v38  ;;  %v1309_v37 = vpack.c.bf16 %v652_v35, %v650_v34  ;;  %v649_v38 = vld [vmem:[#allocation11 + $0x100] sm:$0xff] }
 0x12b   :  { %v779_v33 = vld [vmem:[#allocation14 + $0x58] sm:$0xff] }
 0x12c   :  { %1188 = vmatpush1.bf16.msra.mxu0 %v1187_v52  ;;  %v619_v52 = vld [vmem:[#allocation11 + $0x10] sm:$0xff]  ;;  %v1349_v35 = vpack.c.bf16 %v779_v33, %v777_v32 }
 0x12d   :  { %1190 = vmatprep.subr.bf16.mxu0 %v1189_v53  ;;  %v1279_v57 = vpack.c.bf16 %v619_v52, %v617_v51  ;;  %v657_v52 = vld [vmem:[#allocation11 + $0x140] sm:$0xff] }
 0x130   :  { %1192 = vmatpush1.bf16.msra.mxu0 %v1191_v58 }
 0x131   :  { %1194 = vmatprep.subr.bf16.mxu0 %v1193_v59  ;;  %v1281_v59 = vpack.c.bf16 %v624_v55, %v622_v54  ;;  %v662_v54 = vld [vmem:[#allocation11 + $0x168] sm:$0xff]  ;;  %v664_v55 = vld [vmem:[#allocation11 + $0x178] sm:$0xff] }
 0x134   :  { %1196 = vmatpush1.bf16.msra.mxu0 %v1195_v0  ;;  %v1283_v0 = vpack.c.bf16 %v623_v61, %v621_v60  ;;  %v666_v60 = vld [vmem:[#allocation11 + $0x188] sm:$0xff]  ;;  %v668_v61 = vld [vmem:[#allocation11 + $0x198] sm:$0xff] }
 0x135   :  { %1198 = vmatprep.subr.bf16.mxu0 %v1197_v1  ;;  %v1285_v1 = vpack.c.bf16 %v628_v63, %v626_v62  ;;  %v1325_v63 = vpack.c.bf16 %v668_v61, %v666_v60 }
 0x138   :  { %1200 = vmatpush1.bf16.msra.mxu0 %v1199_v6  ;;  %v1287_v6 = vpack.c.bf16 %v627_v3, %v625_v2  ;;  %v670_v2 = vld [vmem:[#allocation11 + $0x1a8] sm:$0xff]  ;;  %v672_v3 = vld [vmem:[#allocation11 + $0x1b8] sm:$0xff] }
 0x139   :  { %1202 = vmatprep.subr.bf16.mxu0 %v1201_v7  ;;  %v1289_v7 = vpack.c.bf16 %v632_v5, %v630_v4  ;;  %v1329_v5 = vpack.c.bf16 %v672_v3, %v670_v2 }
 0x13c   :  { %1204 = vmatpush1.bf16.msra.mxu0 %v1203_v12  ;;  %v1291_v12 = vpack.c.bf16 %v631_v9, %v629_v8  ;;  %v674_v9 = vld [vmem:[#allocation11 + $0x1c8] sm:$0xff] }
 0x13d   :  { %1206 = vmatprep.subr.bf16.mxu0 %v1205_v13  ;;  %v1293_v13 = vpack.c.bf16 %v636_v11, %v634_v10  ;;  %v676_v10 = vld [vmem:[#allocation11 + $0x1d8] sm:$0xff] }
 0x13e   :  { %v1333_v11 = vpack.c.bf16 %v676_v10, %v674_v9  ;;  %v800_v10 = vld [vmem:[#allocation14 + $0x100] sm:$0xff] }
 0x140   :  { %1208 = vmatpush1.bf16.msra.mxu0 %v1207_v18  ;;  %v1295_v18 = vpack.c.bf16 %v635_v15, %v633_v14  ;;  %v678_v15 = vld [vmem:[#allocation11 + $0x1e8] sm:$0xff] }
 0x141   :  { %1210 = vmatprep.subr.bf16.mxu0 %v1209_v19  ;;  %v1297_v19 = vpack.c.bf16 %v640_v17, %v638_v16  ;;  %v680_v16 = vld [vmem:[#allocation11 + $0x1f8] sm:$0xff] }
 0x142   :  { %v1337_v17 = vpack.c.bf16 %v680_v16, %v678_v15  ;;  %v804_v16 = vld [vmem:[#allocation14 + $0x120] sm:$0xff] }
 0x144   :  { %1212 = vmatpush1.bf16.msra.mxu0 %v1211_v22  ;;  %v642_v22 = vld [vmem:[#allocation11 + $0xc8] sm:$0xff] }
 0x147   :  { %456 = vmatmul.mubr.f32.vlgmr.msra.gmra.mrb[0].mxu0 %v178_v23  ;;  %v644_v23 = vld [vmem:[#allocation11 + $0xd8] sm:$0xff] }
 0x148   :  { %v1301_v25 = vpack.c.bf16 %v644_v23, %v642_v22  ;;  %v771_v22 = vld [vmem:[#allocation14 + $0x18] sm:$0xff]  ;;  %v768_v23 = vld [vmem:[#allocation14] sm:$0xff] }
 0x21a   :  { %v457_v46 = vpop.f32.mrb[0].mxu0 }
 0x21b   :  { %v1437_v47 = vadd.f32 %v457_v46, %v313_v44  ;;  %v459_v48 = vpop.f32.mrb[1].mxu0  ;;  %v1311_v44 = vpack.c.bf16 %v651_v39, %v649_v38  ;;  %v653_v46 = vld [vmem:[#allocation11 + $0x120] sm:$0xff]  ;;  %v781_v38 = vld [vmem:[#allocation14 + $0x68] sm:$0xff] }
 0x21c   :  { %v1438_v49 = vadd.f32 %v459_v48, %v317_v45  ;;  %v1313_v45 = vpack.c.bf16 %v656_v42, %v654_v40  ;;  %v658_v48 = vld [vmem:[#allocation11 + $0x148] sm:$0xff]  ;;  %v783_v39 = vld [vmem:[#allocation14 + $0x78] sm:$0xff] }
 0x21d   :  { %v462_v50 = vmul.f32 0.1, %v1437_v47  ;;  %v1353_v42 = vpack.c.bf16 %v783_v39, %v781_v38 }
 0x21e   :  { %v463_v53 = vmul.f32 0.1, %v1438_v49 }
 0x21f   :  { %v464_v58 = vmax.f32 %v1437_v47, %v462_v50  ;;  %v655_v47 = vld [vmem:[#allocation11 + $0x130] sm:$0xff] }
 0x220   :  { %v465_v56 = vmax.f32 %v1438_v49, %v463_v53  ;;  %v660_v49 = vld [vmem:[#allocation11 + $0x158] sm:$0xff]  ;;  %v1315_v50 = vpack.c.bf16 %v655_v47, %v653_v46  ;;  %v659_v53 = vld [vmem:[#allocation11 + $0x150] sm:$0xff] }
 0x221   :  { %v1317_v51 = vpack.c.bf16 %v660_v49, %v658_v48  ;;  %v785_v46 = vld [vmem:[#allocation14 + $0x88] sm:$0xff]  ;;  %v787_v47 = vld [vmem:[#allocation14 + $0x98] sm:$0xff] }
 0x222   :  { %606 = vmatprep.mubr.f32.mxu1 %v465_v56  ;;  %v1319_v56 = vpack.c.bf16 %v659_v53, %v657_v52  ;;  %v1357_v49 = vpack.c.bf16 %v787_v47, %v785_v46  ;;  %v789_v52 = vld [vmem:[#allocation14 + $0xa8] sm:$0xff]  ;;  %v791_v53 = vld [vmem:[#allocation14 + $0xb8] sm:$0xff] }
 0x223   :  { %607 = vmatmul.mubr.f32.vlgmr.msra.gmra.mrb[0].mxu1 %v464_v58  ;;  %v661_v58 = vld [vmem:[#allocation11 + $0x160] sm:$0xff] }
 0x224   :  { %1280 = vmatpush1.bf16.msra.mxu1 %v1279_v57  ;;  %v1321_v57 = vpack.c.bf16 %v664_v55, %v662_v54  ;;  %v1361_v55 = vpack.c.bf16 %v791_v53, %v789_v52 }
 0x225   :  { %1282 = vmatprep.subr.bf16.mxu1 %v1281_v59  ;;  %v663_v59 = vld [vmem:[#allocation11 + $0x170] sm:$0xff] }
 0x226   :  { %v1323_v62 = vpack.c.bf16 %v663_v59, %v661_v58  ;;  %v793_v58 = vld [vmem:[#allocation14 + $0xc8] sm:$0xff]  ;;  %v795_v59 = vld [vmem:[#allocation14 + $0xd8] sm:$0xff] }
 0x227   :  { %v1365_v61 = vpack.c.bf16 %v795_v59, %v793_v58  ;;  %v824_v59 = vld [vmem:[#allocation14 + $0x1c0] sm:$0xff] }
 0x228   :  { %1284 = vmatpush1.bf16.msra.mxu1 %v1283_v0  ;;  %v665_v0 = vld [vmem:[#allocation11 + $0x180] sm:$0xff] }
 0x229   :  { %1286 = vmatprep.subr.bf16.mxu1 %v1285_v1  ;;  %v667_v1 = vld [vmem:[#allocation11 + $0x190] sm:$0xff] }
 0x22a   :  { %v1327_v4 = vpack.c.bf16 %v667_v1, %v665_v0  ;;  %v797_v0 = vld [vmem:[#allocation14 + $0xe8] sm:$0xff]  ;;  %v799_v1 = vld [vmem:[#allocation14 + $0xf8] sm:$0xff] }
 0x22b   :  { %v1369_v3 = vpack.c.bf16 %v799_v1, %v797_v0  ;;  %v828_v1 = vld [vmem:[#allocation14 + $0x1e0] sm:$0xff] }
 0x22c   :  { %1288 = vmatpush1.bf16.msra.mxu1 %v1287_v6  ;;  %v669_v6 = vld [vmem:[#allocation11 + $0x1a0] sm:$0xff] }
 0x22d   :  { %1290 = vmatprep.subr.bf16.mxu1 %v1289_v7  ;;  %v671_v7 = vld [vmem:[#allocation11 + $0x1b0] sm:$0xff] }
 0x22e   :  { %v1331_v8 = vpack.c.bf16 %v671_v7, %v669_v6  ;;  %v801_v6 = vld [vmem:[#allocation14 + $0x108] sm:$0xff]  ;;  %v803_v7 = vld [vmem:[#allocation14 + $0x118] sm:$0xff] }
 0x22f   :  { %v1373_v9 = vpack.c.bf16 %v803_v7, %v801_v6  ;;  %v919_v6 = vld [vmem:[#allocation17] sm:$0xff] }
 0x230   :  { %1292 = vmatpush1.bf16.msra.mxu1 %v1291_v12  ;;  %v673_v12 = vld [vmem:[#allocation11 + $0x1c0] sm:$0xff] }
 0x231   :  { %1294 = vmatprep.subr.bf16.mxu1 %v1293_v13  ;;  %v675_v13 = vld [vmem:[#allocation11 + $0x1d0] sm:$0xff] }
 0x232   :  { %v1335_v14 = vpack.c.bf16 %v675_v13, %v673_v12  ;;  %v805_v12 = vld [vmem:[#allocation14 + $0x128] sm:$0xff]  ;;  %v807_v13 = vld [vmem:[#allocation14 + $0x138] sm:$0xff] }
 0x233   :  { %v1377_v15 = vpack.c.bf16 %v807_v13, %v805_v12  ;;  %v921_v13 = vld [vmem:[#allocation17 + $0x10] sm:$0xff] }
 0x234   :  { %1296 = vmatpush1.bf16.msra.mxu1 %v1295_v18  ;;  %v677_v18 = vld [vmem:[#allocation11 + $0x1e0] sm:$0xff] }
 0x235   :  { %1298 = vmatprep.subr.bf16.mxu1 %v1297_v19  ;;  %v679_v19 = vld [vmem:[#allocation11 + $0x1f0] sm:$0xff] }
 0x236   :  { %v1339_v20 = vpack.c.bf16 %v679_v19, %v677_v18  ;;  %v809_v18 = vld [vmem:[#allocation14 + $0x148] sm:$0xff]  ;;  %v811_v19 = vld [vmem:[#allocation14 + $0x158] sm:$0xff] }
 0x238   :  { %1300 = vmatpush1.bf16.msra.mxu1 %v1299_v24  ;;  %v1341_v24 = vpack.c.bf16 %v771_v22, %v769_v21  ;;  %v1381_v21 = vpack.c.bf16 %v811_v19, %v809_v18  ;;  %v808_v22 = vld [vmem:[#allocation14 + $0x140] sm:$0xff] }
 0x239   :  { %1302 = vmatprep.subr.bf16.mxu1 %v1301_v25  ;;  %v770_v25 = vld [vmem:[#allocation14 + $0x10] sm:$0xff]  ;;  %v923_v19 = vld [vmem:[#allocation17 + $0x20] sm:$0xff] }
 0x23a   :  { %v1343_v28 = vpack.c.bf16 %v770_v25, %v768_v23  ;;  %1342 = vmatprep.subr.bf16.mxu0 %v1341_v24  ;;  %v810_v23 = vld [vmem:[#allocation14 + $0x150] sm:$0xff]  ;;  %v813_v24 = vld [vmem:[#allocation14 + $0x168] sm:$0xff]  ;;  %v815_v25 = vld [vmem:[#allocation14 + $0x178] sm:$0xff] }
 0x23b   :  { %v1383_v26 = vpack.c.bf16 %v810_v23, %v808_v22  ;;  %v1385_v27 = vpack.c.bf16 %v815_v25, %v813_v24  ;;  %v942_v22 = vld [vmem:[#allocation17 + $0xb8] sm:$0xff]  ;;  %v925_v25 = vld [vmem:[#allocation17 + $0x30] sm:$0xff] }
 0x23c   :  { %1304 = vmatpush1.bf16.msra.mxu1 %v1303_v30  ;;  %v772_v30 = vld [vmem:[#allocation14 + $0x20] sm:$0xff]  ;;  %1344 = vmatpush1.bf16.msra.mxu0 %v1343_v28 }
 0x23d   :  { %1306 = vmatprep.subr.bf16.mxu1 %v1305_v31  ;;  %v774_v31 = vld [vmem:[#allocation14 + $0x30] sm:$0xff]  ;;  %1346 = vmatprep.subr.bf16.mxu0 %v1345_v29  ;;  %v812_v28 = vld [vmem:[#allocation14 + $0x160] sm:$0xff] }
 0x23e   :  { %v1347_v34 = vpack.c.bf16 %v774_v31, %v772_v30  ;;  %v814_v29 = vld [vmem:[#allocation14 + $0x170] sm:$0xff]  ;;  %v817_v30 = vld [vmem:[#allocation14 + $0x188] sm:$0xff]  ;;  %v819_v31 = vld [vmem:[#allocation14 + $0x198] sm:$0xff] }
 0x23f   :  { %v1387_v32 = vpack.c.bf16 %v814_v29, %v812_v28  ;;  %v1389_v33 = vpack.c.bf16 %v819_v31, %v817_v30  ;;  %v944_v28 = vld [vmem:[#allocation17 + $0xc8] sm:$0xff]  ;;  %v927_v31 = vld [vmem:[#allocation17 + $0x40] sm:$0xff] }
 0x240   :  { %1308 = vmatpush1.bf16.msra.mxu1 %v1307_v36  ;;  %v776_v36 = vld [vmem:[#allocation14 + $0x40] sm:$0xff]  ;;  %1348 = vmatpush1.bf16.msra.mxu0 %v1347_v34 }
 0x241   :  { %1310 = vmatprep.subr.bf16.mxu1 %v1309_v37  ;;  %v778_v37 = vld [vmem:[#allocation14 + $0x50] sm:$0xff]  ;;  %1350 = vmatprep.subr.bf16.mxu0 %v1349_v35  ;;  %v816_v34 = vld [vmem:[#allocation14 + $0x180] sm:$0xff] }
 0x242   :  { %v1351_v40 = vpack.c.bf16 %v778_v37, %v776_v36  ;;  %v818_v35 = vld [vmem:[#allocation14 + $0x190] sm:$0xff]  ;;  %v821_v36 = vld [vmem:[#allocation14 + $0x1a8] sm:$0xff]  ;;  %v823_v37 = vld [vmem:[#allocation14 + $0x1b8] sm:$0xff] }
 0x243   :  { %v1391_v38 = vpack.c.bf16 %v818_v35, %v816_v34  ;;  %v1393_v39 = vpack.c.bf16 %v823_v37, %v821_v36  ;;  %v946_v34 = vld [vmem:[#allocation17 + $0xd8] sm:$0xff]  ;;  %v929_v37 = vld [vmem:[#allocation17 + $0x50] sm:$0xff] }
 0x244   :  { %1312 = vmatpush1.bf16.msra.mxu1 %v1311_v44  ;;  %v780_v44 = vld [vmem:[#allocation14 + $0x60] sm:$0xff]  ;;  %1352 = vmatpush1.bf16.msra.mxu0 %v1351_v40 }
 0x245   :  { %1314 = vmatprep.subr.bf16.mxu1 %v1313_v45  ;;  %v782_v45 = vld [vmem:[#allocation14 + $0x70] sm:$0xff]  ;;  %1354 = vmatprep.subr.bf16.mxu0 %v1353_v42  ;;  %v820_v40 = vld [vmem:[#allocation14 + $0x1a0] sm:$0xff] }
 0x246   :  { %v1355_v48 = vpack.c.bf16 %v782_v45, %v780_v44  ;;  %v822_v42 = vld [vmem:[#allocation14 + $0x1b0] sm:$0xff]  ;;  %v530_v45 = vld [vmem:[#allocation10] sm:$0x3] }
 0x247   :  { %v1395_v44 = vpack.c.bf16 %v822_v42, %v820_v40  ;;  %v535_v46 = vrot.slane %v530_v45, %v1955_v41  ;;  %v539_v47 = vrot.slane %v530_v45, %v1957_v43  ;;  %v681_v40 = vld [vmem:[#allocation13] sm:$0x3] }
 0x248   :  { %1316 = vmatpush1.bf16.msra.mxu1 %v1315_v50  ;;  %v784_v50 = vld [vmem:[#allocation14 + $0x80] sm:$0xff]  ;;  %1356 = vmatpush1.bf16.msra.mxu0 %v1355_v48  ;;  %v686_v42 = vrot.slane %v681_v40, %v1955_v41 }
 0x249   :  { %1318 = vmatprep.subr.bf16.mxu1 %v1317_v51  ;;  %v786_v51 = vld [vmem:[#allocation14 + $0x90] sm:$0xff]  ;;  %1358 = vmatprep.subr.bf16.mxu0 %v1357_v49 }
 0x24a   :  { %v1359_v54 = vpack.c.bf16 %v786_v51, %v784_v50 }
 0x24c   :  { %1320 = vmatpush1.bf16.msra.mxu1 %v1319_v56  ;;  %v788_v56 = vld [vmem:[#allocation14 + $0xa0] sm:$0xff]  ;;  %1360 = vmatpush1.bf16.msra.mxu0 %v1359_v54 }
 0x24d   :  { %1322 = vmatprep.subr.bf16.mxu1 %v1321_v57  ;;  %v790_v57 = vld [vmem:[#allocation14 + $0xb0] sm:$0xff]  ;;  %1362 = vmatprep.subr.bf16.mxu0 %v1361_v55 }
 0x24e   :  { %v1363_v60 = vpack.c.bf16 %v790_v57, %v788_v56  ;;  %v825_v56 = vld [vmem:[#allocation14 + $0x1c8] sm:$0xff]  ;;  %v827_v57 = vld [vmem:[#allocation14 + $0x1d8] sm:$0xff] }
 0x24f   :  { %v1397_v58 = vpack.c.bf16 %v827_v57, %v825_v56  ;;  %v931_v56 = vld [vmem:[#allocation17 + $0x60] sm:$0xff]  ;;  %v932_v57 = vld [vmem:[#allocation17 + $0x68] sm:$0xff] }
 0x250   :  { %1324 = vmatpush1.bf16.msra.mxu1 %v1323_v62  ;;  %v792_v62 = vld [vmem:[#allocation14 + $0xc0] sm:$0xff]  ;;  %1364 = vmatpush1.bf16.msra.mxu0 %v1363_v60  ;;  %v826_v60 = vld [vmem:[#allocation14 + $0x1d0] sm:$0xff] }
 0x251   :  { %1326 = vmatprep.subr.bf16.mxu1 %v1325_v63  ;;  %v794_v63 = vld [vmem:[#allocation14 + $0xd0] sm:$0xff]  ;;  %1366 = vmatprep.subr.bf16.mxu0 %v1365_v61  ;;  %v1399_v61 = vpack.c.bf16 %v826_v60, %v824_v59  ;;  %v950_v60 = vld [vmem:[#allocation17 + $0xf8] sm:$0xff] }
 0x252   :  { %v1367_v2 = vpack.c.bf16 %v794_v63, %v792_v62  ;;  %v829_v62 = vld [vmem:[#allocation14 + $0x1e8] sm:$0xff]  ;;  %v831_v63 = vld [vmem:[#allocation14 + $0x1f8] sm:$0xff] }
 0x253   :  { %v1401_v0 = vpack.c.bf16 %v831_v63, %v829_v62  ;;  %v949_v59 = vld [vmem:[#allocation17 + $0xf0] sm:$0xff]  ;;  %v934_v63 = vld [vmem:[#allocation17 + $0x78] sm:$0xff] }
 0x254   :  { %1328 = vmatpush1.bf16.msra.mxu1 %v1327_v4  ;;  %v796_v4 = vld [vmem:[#allocation14 + $0xe0] sm:$0xff]  ;;  %1368 = vmatpush1.bf16.msra.mxu0 %v1367_v2  ;;  %v830_v2 = vld [vmem:[#allocation14 + $0x1f0] sm:$0xff] }
 0x255   :  { %1330 = vmatprep.subr.bf16.mxu1 %v1329_v5  ;;  %v798_v5 = vld [vmem:[#allocation14 + $0xf0] sm:$0xff]  ;;  %1370 = vmatprep.subr.bf16.mxu0 %v1369_v3  ;;  %v1403_v3 = vpack.c.bf16 %v830_v2, %v828_v1  ;;  %v832_v1 = vld [vmem:[#allocation16] sm:$0x3] }
 0x256   :  { %v933_v62 = vld [vmem:[#allocation17 + $0x70] sm:$0xff]  ;;  %v837_v2 = vrot.slane %v832_v1, %v1955_v41 }
 0x258   :  { %1332 = vmatpush1.bf16.msra.mxu1 %v1331_v8  ;;  %v1371_v8 = vpack.c.bf16 %v798_v5, %v796_v4  ;;  %v935_v4 = vld [vmem:[#allocation17 + $0x80] sm:$0xff]  ;;  %v936_v5 = vld [vmem:[#allocation17 + $0x88] sm:$0xff] }
 0x259   :  { %1334 = vmatprep.subr.bf16.mxu1 %v1333_v11  ;;  %v802_v11 = vld [vmem:[#allocation14 + $0x110] sm:$0xff]  ;;  %v1405_v7 = vpack.c.bf16 %v936_v5, %v935_v4 }
 0x25a   :  { %1372 = vmatpush1.bf16.msra.mxu0 %v1371_v8  ;;  %v920_v8 = vld [vmem:[#allocation17 + $0x8] sm:$0xff] }
 0x25b   :  { %1374 = vmatprep.subr.bf16.mxu0 %v1373_v9  ;;  %v937_v9 = vld [vmem:[#allocation17 + $0x90] sm:$0xff] }
 0x25c   :  { %1336 = vmatpush1.bf16.msra.mxu1 %v1335_v14  ;;  %v1375_v14 = vpack.c.bf16 %v802_v11, %v800_v10  ;;  %v938_v10 = vld [vmem:[#allocation17 + $0x98] sm:$0xff]  ;;  %v1407_v11 = vpack.c.bf16 %v920_v8, %v919_v6 }
 0x25d   :  { %1338 = vmatprep.subr.bf16.mxu1 %v1337_v17  ;;  %v806_v17 = vld [vmem:[#allocation14 + $0x130] sm:$0xff]  ;;  %v1409_v12 = vpack.c.bf16 %v938_v10, %v937_v9 }
 0x25e   :  { %1376 = vmatpush1.bf16.msra.mxu0 %v1375_v14  ;;  %v922_v14 = vld [vmem:[#allocation17 + $0x18] sm:$0xff] }
 0x25f   :  { %1378 = vmatprep.subr.bf16.mxu0 %v1377_v15  ;;  %v939_v15 = vld [vmem:[#allocation17 + $0xa0] sm:$0xff] }
 0x260   :  { %1340 = vmatpush1.bf16.msra.mxu1 %v1339_v20  ;;  %v1379_v20 = vpack.c.bf16 %v806_v17, %v804_v16  ;;  %v940_v16 = vld [vmem:[#allocation17 + $0xa8] sm:$0xff]  ;;  %v1411_v17 = vpack.c.bf16 %v922_v14, %v921_v13  ;;  %v1049_v13 = vld [vmem:[#allocation19] ss:$0 sm:$0xff] }
 0x261   :  { %1406 = vmatprep.subr.bf16.mxu1 %v1405_v7  ;;  %v1413_v18 = vpack.c.bf16 %v940_v16, %v939_v15 }
 0x262   :  { %1380 = vmatpush1.bf16.msra.mxu0 %v1379_v20  ;;  %v924_v20 = vld [vmem:[#allocation17 + $0x28] sm:$0xff] }
 0x263   :  { %1382 = vmatprep.subr.bf16.mxu0 %v1381_v21  ;;  %v941_v21 = vld [vmem:[#allocation17 + $0xb0] sm:$0xff]  ;;  %v1415_v23 = vpack.c.bf16 %v924_v20, %v923_v19 }
 0x264   :  { %v1417_v24 = vpack.c.bf16 %v942_v22, %v941_v21 }
 0x266   :  { %1384 = vmatpush1.bf16.msra.mxu0 %v1383_v26  ;;  %v926_v26 = vld [vmem:[#allocation17 + $0x38] sm:$0xff] }
 0x267   :  { %1386 = vmatprep.subr.bf16.mxu0 %v1385_v27  ;;  %v943_v27 = vld [vmem:[#allocation17 + $0xc0] sm:$0xff]  ;;  %v1419_v29 = vpack.c.bf16 %v926_v26, %v925_v25 }
 0x268   :  { %v1421_v30 = vpack.c.bf16 %v944_v28, %v943_v27 }
 0x26a   :  { %1388 = vmatpush1.bf16.msra.mxu0 %v1387_v32  ;;  %v928_v32 = vld [vmem:[#allocation17 + $0x48] sm:$0xff] }
 0x26b   :  { %1390 = vmatprep.subr.bf16.mxu0 %v1389_v33  ;;  %v945_v33 = vld [vmem:[#allocation17 + $0xd0] sm:$0xff]  ;;  %v1423_v35 = vpack.c.bf16 %v928_v32, %v927_v31 }
 0x26c   :  { %v1425_v36 = vpack.c.bf16 %v946_v34, %v945_v33 }
 0x26e   :  { %1392 = vmatpush1.bf16.msra.mxu0 %v1391_v38  ;;  %v930_v38 = vld [vmem:[#allocation17 + $0x58] sm:$0xff] }
 0x26f   :  { %1394 = vmatprep.subr.bf16.mxu0 %v1393_v39  ;;  %v1427_v39 = vpack.c.bf16 %v930_v38, %v929_v37 }
 0x272   :  { %1396 = vmatpush1.bf16.msra.mxu0 %v1395_v44  ;;  %v690_v44 = vrot.slane %v681_v40, %v1957_v43 }
 0x273   :  { %1398 = vmatprep.subr.bf16.mxu0 %v1397_v58  ;;  %v1431_v58 = vpack.c.bf16 %v932_v57, %v931_v56 }
 0x276   :  { %1400 = vmatpush1.bf16.msra.mxu0 %v1399_v61  ;;  %v1433_v61 = vpack.c.bf16 %v950_v60, %v949_v59 }
 0x277   :  { %1402 = vmatprep.subr.bf16.mxu0 %v1401_v0  ;;  %v1435_v0 = vpack.c.bf16 %v934_v63, %v933_v62 }
 0x27a   :  { %1404 = vmatpush1.bf16.msra.mxu0 %v1403_v3  ;;  %v841_v3 = vrot.slane %v832_v1, %v1957_v43 }
 0x2f6   :  { %v608_v48 = vpop.f32.mrb[0].mxu1 }
 0x2f7   :  { %v609_v49 = vadd.f32 %v608_v48, %v535_v46  ;;  %v610_v50 = vpop.f32.mrb[1].mxu1 }
 0x2f8   :  { %v611_v51 = vadd.f32 %v610_v50, %v539_v47 }
 0x2f9   :  { %v613_v52 = vmul.f32 0.1, %v609_v49 }
 0x2fa   :  { %v614_v53 = vmul.f32 0.1, %v611_v51 }
 0x2fb   :  { %v615_v55 = vmax.f32 %v609_v49, %v613_v52 }
 0x2fc   :  { %v616_v54 = vmax.f32 %v611_v51, %v614_v53  ;;  %v947_v53 = vld [vmem:[#allocation17 + $0xe0] sm:$0xff] }
 0x2fe   :  { %757 = vmatprep.mubr.f32.mxu1 %v616_v54  ;;  %v948_v54 = vld [vmem:[#allocation17 + $0xe8] sm:$0xff] }
 0x2ff   :  { %758 = vmatmul.mubr.f32.vlgmr.msra.gmra.mrb[2].mxu1 %v615_v55  ;;  %v1429_v55 = vpack.c.bf16 %v948_v54, %v947_v53 }
 0x300   :  { %1408 = vmatpush3.bf16.msra.mxu1 %v1407_v11 }
 0x301   :  { %1410 = vmatprep.subr.bf16.mxu1 %v1409_v12 }
 0x304   :  { %1412 = vmatpush3.bf16.msra.mxu1 %v1411_v17 }
 0x305   :  { %1414 = vmatprep.subr.bf16.mxu1 %v1413_v18 }
 0x308   :  { %1416 = vmatpush3.bf16.msra.mxu1 %v1415_v23 }
 0x309   :  { %1418 = vmatprep.subr.bf16.mxu1 %v1417_v24 }
 0x30c   :  { %1420 = vmatpush3.bf16.msra.mxu1 %v1419_v29 }
 0x30d   :  { %1422 = vmatprep.subr.bf16.mxu1 %v1421_v30 }
 0x310   :  { %1424 = vmatpush3.bf16.msra.mxu1 %v1423_v35 }
 0x311   :  { %1426 = vmatprep.subr.bf16.mxu1 %v1425_v36 }
 0x314   :  { %1428 = vmatpush3.bf16.msra.mxu1 %v1427_v39 }
 0x315   :  { %1430 = vmatprep.subr.bf16.mxu1 %v1429_v55 }
 0x318   :  { %1432 = vmatpush3.bf16.msra.mxu1 %v1431_v58 }
 0x319   :  { %1434 = vmatprep.subr.bf16.mxu1 %v1433_v61 }
 0x31c   :  { %1436 = vmatpush3.bf16.msra.mxu1 %v1435_v0 }
 0x3d2   :  { %v759_v45 = vpop.f32.mrb[2].mxu1 }
 0x3d3   :  { %v760_v46 = vadd.f32 %v759_v45, %v686_v42  ;;  %v761_v47 = vpop.f32.mrb[3].mxu1 }
 0x3d4   :  { %v762_v48 = vadd.f32 %v761_v47, %v690_v44 }
 0x3d5   :  { %v764_v49 = vmul.f32 0.1, %v760_v46 }
 0x3d6   :  { %v765_v50 = vmul.f32 0.1, %v762_v48 }
 0x3d7   :  { %v766_v52 = vmax.f32 %v760_v46, %v764_v49 }
 0x3d8   :  { %v767_v51 = vmax.f32 %v762_v48, %v765_v50 }
 0x3da   :  { %908 = vmatprep.mubr.f32.mxu0 %v767_v51 }
 0x3db   :  { %909 = vmatmul.mubr.f32.vlgmr.msra.gmra.mrb[2].mxu0 %v766_v52 }
 0x4ae   :  { %v910_v4 = vpop.f32.mrb[2].mxu0 }
 0x4af   :  { %v911_v5 = vadd.f32 %v910_v4, %v837_v2  ;;  %v912_v6 = vpop.f32.mrb[3].mxu0 }
 0x4b0   :  { %v913_v7 = vadd.f32 %v912_v6, %v841_v3 }
 0x4b1   :  { %v915_v8 = vmul.f32 0.1, %v911_v5 }
 0x4b2   :  { %v916_v9 = vmul.f32 0.1, %v913_v7 }
 0x4b3   :  { %v917_v11 = vmax.f32 %v911_v5, %v915_v8 }
 0x4b4   :  { %v918_v10 = vmax.f32 %v913_v7, %v916_v9 }
 0x4b6   :  { %1022 = vmatprep.mubr.f32.mxu1 %v918_v10 }
 0x4b7   :  { %1023 = vmatmul.mubr.f32.vlgmr.msra.gmra.mrb[4].mxu1 %v917_v11 }
 0x58a   :  { %v1082_v12 = vpop.f32.mrb[4].mxu1 }
 0x58b   :  { %v1083_v14 = vpop.f32.mrb[5].mxu1 }
 0x58c   :  { %v1084_v15 = vadd.f32 %v1083_v14, %v1082_v12 }
 0x58e   :  { %v1025_v16 = vadd.f32 %v1084_v15, %v1049_v13 }
 0x590   :  { %1028 = vst [vmem:[#allocation20] sm:$0xff] %v1025_v16 }
 0x591   :  { %1710 = shalt.err (!%p1707_p8)
}
 0x592   :  { %s1711_s27 = scalar_lea.hbm %s1990_s11, 128 }
 0x593   :  { %p1712_p9 = scmp.ne.s32.totalorder %s1990_s11, %s1711_s27  ;;  %p1715_p10 = scmp.lt.u32.totalorder %s1711_s27, %s1990_s11 }
 0x595   :  { %p1717_p11 = pnand %p1715_p10, %p1712_p9 }
 0x597   :  { %1720 = shalt.err (!%p1717_p11)
}
 0x598   :  { %1038 = dma.vmem_to_hbm [thread:$0]  %s1036_s19, 128, %s1990_s11, [#allocation4]  }
 0x599   :  { %1733 = dma.done.wait [#allocation4], 128  }
 0x59a   :  { %1734 = vsyncadd [#allocation4], 4294967168 }
 0x59b   :  { %1042 = vsyncpa [#allocation3], 1 }
 0x59c   :  { %1043 = vsyncpa [#allocation6], 1 }
 0x59d   :  { %1044 = vsyncpa [#allocation9], 1 }
 0x59e   :  { %1045 = vsyncpa [#allocation12], 1 }
 0x59f   :  { %1046 = vsyncpa [#allocation15], 1 }
 0x5a0   :  { %1047 = vsyncpa [#allocation18], 1 }
 0x5a1   :  { %1048 = vsyncpa [#allocation4], 1 }

</bundles_post_ra>
